<compile_context>
chip_gen: v6e
topology: v6e:2x2x1
jax: 0.10.0
libtpu: 0.0.40
codegen_flags: <defaults>
</compile_context>

<pallas_src>
import jax
import jax.numpy as jnp
from jax import lax
from jax.experimental import pallas as pl
from jax.experimental.pallas import tpu as pltpu


def _make_kernel(T_total):
    """Kernel factory (T_total baked in for ragged last-chunk masking)."""

    def kernel(emb_ref, wih_ref, whh_ref, b_ref, wfc_ref, bfc_ref,
               out_ref, h_scr, c_scr, xg_scr):
        chunk = pl.program_id(0)
        n_chunks = pl.num_programs(0)
        Bp, Hk = h_scr.shape
        G = xg_scr.shape[1]
        Hg = G // 4                       # lane-aligned per-gate block width
        Tc = xg_scr.shape[0] // Bp
        ragged = (T_total % Tc) != 0      # Python bool, trace-time

        @pl.when(chunk == 0)
        def _():
            h_scr[...] = jnp.zeros_like(h_scr)
            c_scr[...] = jnp.zeros_like(c_scr)

        # Phase 1 (non-recurrent): input projection for ALL timesteps of the
        # chunk as one big MXU matmul, combined bias folded in once.
        xg_scr[...] = (jnp.dot(emb_ref[...], wih_ref[...],
                               preferred_element_type=jnp.float32)
                       + b_ref[...])

        # Number of real (non-padded) timesteps in this chunk.
        n_valid = jnp.minimum(Tc, T_total - chunk * Tc)

        # Phase 2: sequential recurrence; one (Bp, Hk) @ (Hk, 4*Hg) matmul per
        # step.  W_hh is read from its VMEM ref here (NOT hoisted to vregs).
        def step(t, carry):
            h, c = carry
            row = pl.multiple_of(t * Bp, Bp)
            gates = xg_scr[pl.ds(row, Bp), :] + jnp.dot(
                h, whh_ref[...], preferred_element_type=jnp.float32)
            # Gate blocks start on 128-lane boundaries; nonlinearities run at
            # width Hk (no work on the guaranteed-zero pad lanes).
            i_g = jax.nn.sigmoid(gates[:, 0 * Hg:0 * Hg + Hk])
            f_g = jax.nn.sigmoid(gates[:, 1 * Hg:1 * Hg + Hk])
            g_g = jnp.tanh(gates[:, 2 * Hg:2 * Hg + Hk])
            o_g = jax.nn.sigmoid(gates[:, 3 * Hg:3 * Hg + Hk])
            c_new = f_g * c + i_g * g_g
            h_new = o_g * jnp.tanh(c_new)
            if ragged:
                keep = t < n_valid
                h_new = jnp.where(keep, h_new, h)
                c_new = jnp.where(keep, c_new, c)
            return h_new, c_new

        h_fin, c_fin = lax.fori_loop(0, Tc, step, (h_scr[...], c_scr[...]),
                                     unroll=min(Tc, 8))
        h_scr[...] = h_fin
        c_scr[...] = c_fin

        # Final fc on the last chunk; use the loop-carried value directly and
        # write a lane-dense (Cp multiple of 128) output tile.
        @pl.when(chunk == n_chunks - 1)
        def _():
            out_ref[...] = (jnp.dot(h_fin, wfc_ref[...],
                                    preferred_element_type=jnp.float32)
                            + bfc_ref[...]).astype(out_ref.dtype)

    return kernel


def _round_up(v, m):
    return (v + m - 1) // m * m


def _pad_gate_mat_T(w, Hg):
    """PyTorch gate matrix (4H, K) -> right-multiply form (K, 4*Hg), each of
    the i/f/g/o blocks zero-padded from H to Hg columns (lane alignment)."""
    fourH, K = w.shape
    H = fourH // 4
    w4 = w.reshape(4, H, K)
    w4 = jnp.pad(w4, ((0, 0), (0, Hg - H), (0, 0)))
    return jnp.transpose(w4, (2, 0, 1)).reshape(K, 4 * Hg)


def _pad_gate_vec(b, Hg):
    H = b.shape[0] // 4
    b4 = jnp.pad(b.reshape(4, H), ((0, 0), (0, Hg - H)))
    return b4.reshape(1, 4 * Hg)


def stack_rnn_forward(x_tokens, params):
    emb_table, w_ih, w_hh, b_ih, b_hh, w_fc, b_fc = params
    H = w_hh.shape[1]
    C = w_fc.shape[0]
    E = emb_table.shape[1]
    B, T = x_tokens.shape

    Bp = _round_up(B, 8)       # fill sublanes
    Hg = _round_up(H, 128)     # lane-align each gate BLOCK (slicing offsets)
    Hk = _round_up(H, 8)       # state / contraction width: sublane-align only
    Cp = _round_up(C, 128)     # lane-dense output
    G = 4 * Hg

    # ---- VMEM-budget-derived chunk length & limit (per generation) ----------
    try:
        phys_vmem = int(pltpu.get_tpu_info().vmem_capacity_bytes)
    except Exception:
        phys_vmem = 64 * 1024 * 1024          # conservative (v7x per-TC size)
    vmem_limit = int(phys_vmem * 0.75)        # ~96 MiB on v5e/v6e, ~48 MiB v7x
    fixed_bytes = 4 * (2 * (E * G + Hk * G + G + Hk * Cp + Cp)   # weights (2x buffered)
                       + 2 * Bp * Hk                             # h, c scratch
                       + 2 * Bp * Cp)                            # output tile
    per_step_bytes = 4 * Bp * (G + 2 * E)     # xg_scr + double-buffered emb chunk
    budget = int(vmem_limit * 0.8) - fixed_bytes
    Tc = int(max(1, min(T, budget // per_step_bytes, 4096)))
    n_chunks = -(-T // Tc)
    T_pad = n_chunks * Tc

    # ---- JAX glue: pad token ids (tiny), gather directly in time-major ------
    # Padded batch rows / padded timesteps use token 0; padded rows are sliced
    # off at the end and padded timesteps are masked inside the kernel.
    x_p = jnp.pad(x_tokens, ((0, Bp - B), (0, T_pad - T)))      # (Bp, T_pad)
    emb_rows = emb_table[x_p.T].reshape(T_pad * Bp, E)          # (T_pad*Bp, E)

    # ---- weight re-layout / padding (right-multiply forms) ------------------
    wih_p = _pad_gate_mat_T(w_ih, Hg)                                  # (E, G)
    whh_p = jnp.pad(_pad_gate_mat_T(w_hh, Hg), ((0, Hk - H), (0, 0)))  # (Hk, G)
    b_p = _pad_gate_vec(b_ih + b_hh, Hg)                               # (1, G)
    wfc_p = jnp.pad(w_fc.T, ((0, Hk - H), (0, Cp - C)))                # (Hk, Cp)
    bfc_p = jnp.pad(b_fc.reshape(1, C), ((0, 0), (0, Cp - C)))         # (1, Cp)

    out_padded = pl.pallas_call(
        _make_kernel(T),
        out_shape=jax.ShapeDtypeStruct((Bp, Cp), jnp.float32),
        grid_spec=pltpu.PrefetchScalarGridSpec(
            num_scalar_prefetch=0,
            grid=(n_chunks,),
            in_specs=[
                pl.BlockSpec((Tc * Bp, E), lambda c: (c, 0)),   # emb chunk (streamed)
                pl.BlockSpec((E, G), lambda c: (0, 0)),         # W_ih^T (gate-padded)
                pl.BlockSpec((Hk, G), lambda c: (0, 0)),        # W_hh^T (Hk rows only)
                pl.BlockSpec((1, G), lambda c: (0, 0)),         # combined bias
                pl.BlockSpec((Hk, Cp), lambda c: (0, 0)),       # W_fc^T
                pl.BlockSpec((1, Cp), lambda c: (0, 0)),        # b_fc
            ],
            out_specs=pl.BlockSpec((Bp, Cp), lambda c: (0, 0)),
            scratch_shapes=[
                pltpu.VMEM((Bp, Hk), jnp.float32),              # h carry
                pltpu.VMEM((Bp, Hk), jnp.float32),              # c carry
                pltpu.VMEM((Tc * Bp, G), jnp.float32),          # precomputed x-gates
            ],
        ),
        compiler_params=pltpu.CompilerParams(
            dimension_semantics=("arbitrary",),                 # time is sequential
            vmem_limit_bytes=vmem_limit),
    )(emb_rows, wih_p, whh_p, b_p, wfc_p, bfc_p)

    return out_padded[:B, :C]


def init_params(key, vocab_size, embed_dim, hidden_dim, num_classes):
    ks = jax.random.split(key, 7)
    s = 1.0 / (hidden_dim ** 0.5)
    emb_table = jax.random.normal(ks[0], (vocab_size, embed_dim), jnp.float32)
    w_ih = jax.random.uniform(ks[1], (4 * hidden_dim, embed_dim),
                              jnp.float32, -s, s)
    w_hh = jax.random.uniform(ks[2], (4 * hidden_dim, hidden_dim),
                              jnp.float32, -s, s)
    b_ih = jax.random.uniform(ks[3], (4 * hidden_dim,), jnp.float32, -s, s)
    b_hh = jax.random.uniform(ks[4], (4 * hidden_dim,), jnp.float32, -s, s)
    w_fc = jax.random.uniform(ks[5], (num_classes, hidden_dim),
                              jnp.float32, -s, s)
    b_fc = jax.random.uniform(ks[6], (num_classes,), jnp.float32, -s, s)
    return (emb_table, w_ih, w_hh, b_ih, b_hh, w_fc, b_fc)


def stack_rnn_reference(x_tokens, params):
    """Pure-JAX reference of the PyTorch forward (for validation)."""
    emb_table, w_ih, w_hh, b_ih, b_hh, w_fc, b_fc = params
    H = w_hh.shape[1]
    emb = emb_table[x_tokens]                  # (B, T, E)
    B = emb.shape[0]

    def step(carry, x_t):
        h, c = carry
        gates = x_t @ w_ih.T + b_ih + h @ w_hh.T + b_hh
        i = jax.nn.sigmoid(gates[:, 0:H])
        f = jax.nn.sigmoid(gates[:, H:2 * H])
        g = jnp.tanh(gates[:, 2 * H:3 * H])
        o = jax.nn.sigmoid(gates[:, 3 * H:4 * H])
        c = f * c + i * g
        h = o * jnp.tanh(c)
        return (h, c), None

    h0 = jnp.zeros((B, H), jnp.float32)
    c0 = jnp.zeros((B, H), jnp.float32)
    (h_n, _), _ = lax.scan(step, (h0, c0), jnp.transpose(emb, (1, 0, 2)))
    return h_n @ w_fc.T + b_fc


if __name__ == "__main__":
    vocab_size, embed_dim, hidden_dim, num_classes = 50, 32, 64, 10
    batch, seq = 2, 8

    key = jax.random.PRNGKey(0)
    k_param, k_tok = jax.random.split(key)
    params = init_params(k_param, vocab_size, embed_dim, hidden_dim,
                         num_classes)
    x_tokens = jax.random.randint(k_tok, (batch, seq), 0, vocab_size,
                                  dtype=jnp.int32)

    fwd = jax.jit(stack_rnn_forward)
    out = jax.block_until_ready(fwd(x_tokens, params))

    ref = stack_rnn_reference(x_tokens, params)
    assert out.shape == (batch, num_classes)
    assert jnp.allclose(out, ref, atol=1e-4, rtol=1e-4), "mismatch vs reference"

    print("KERNEL_OK")
</pallas_src>

<mosaic_0001>
module attributes {stable_mosaic.version = 11 : i64} {
  func.func @kernel(%arg0: i32, %arg1: memref<64x32xf32, #tpu.memory_space<vmem>>, %arg2: memref<32x512xf32, #tpu.memory_space<vmem>>, %arg3: memref<64x512xf32, #tpu.memory_space<vmem>>, %arg4: memref<1x512xf32, #tpu.memory_space<vmem>>, %arg5: memref<64x128xf32, #tpu.memory_space<vmem>>, %arg6: memref<1x128xf32, #tpu.memory_space<vmem>>, %arg7: memref<8x128xf32, #tpu.memory_space<vmem>>, %arg8: memref<8x64xf32, #tpu.memory_space<vmem>>, %arg9: memref<8x64xf32, #tpu.memory_space<vmem>>, %arg10: memref<64x512xf32, #tpu.memory_space<vmem>>) attributes {dimension_semantics = [#tpu.dimension_semantics<arbitrary>], iteration_bounds = array<i64: 1>, scalar_prefetch = 0 : i64, scratch_operands = 3 : i64, tpu.core_type = #tpu.core_type<tc>, window_params = [{transform_indices = @transform_0, window_bounds = array<i64: 64, 32>}, {pipeline_mode = #tpu.pipeline_mode<synchronous>, transform_indices = @transform_1, window_bounds = array<i64: 32, 512>}, {pipeline_mode = #tpu.pipeline_mode<synchronous>, transform_indices = @transform_2, window_bounds = array<i64: 64, 512>}, {pipeline_mode = #tpu.pipeline_mode<synchronous>, transform_indices = @transform_3, window_bounds = array<i64: 1, 512>}, {pipeline_mode = #tpu.pipeline_mode<synchronous>, transform_indices = @transform_4, window_bounds = array<i64: 64, 128>}, {pipeline_mode = #tpu.pipeline_mode<synchronous>, transform_indices = @transform_5, window_bounds = array<i64: 1, 128>}, {pipeline_mode = #tpu.pipeline_mode<synchronous>, transform_indices = @transform_6, window_bounds = array<i64: 8, 128>}]} {
    %c0_i32 = arith.constant 0 : i32
    %0 = arith.cmpi eq, %arg0, %c0_i32 : i32
    %1 = arith.extui %0 : i1 to i32
    %c0_i32_0 = arith.constant 0 : i32
    %2 = arith.cmpi ne, %1, %c0_i32_0 : i32
    scf.if %2 {
      %cst_83 = arith.constant 0.000000e+00 : f32
      %273 = vector.broadcast %cst_83 : f32 to vector<8x64xf32>
      %c0_84 = arith.constant 0 : index
      %c0_85 = arith.constant 0 : index
      %274 = vector.load %arg8[%c0_84, %c0_85] : memref<8x64xf32, #tpu.memory_space<vmem>>, vector<8x64xf32>
      tpu.vector_store %arg8[%c0_84, %c0_85], %273 {strides = array<i32>} : memref<8x64xf32, #tpu.memory_space<vmem>>, vector<8x64xf32>,
      %cst_86 = arith.constant 0.000000e+00 : f32
      %275 = vector.broadcast %cst_86 : f32 to vector<8x64xf32>
      %c0_87 = arith.constant 0 : index
      %c0_88 = arith.constant 0 : index
      %276 = vector.load %arg9[%c0_87, %c0_88] : memref<8x64xf32, #tpu.memory_space<vmem>>, vector<8x64xf32>
      tpu.vector_store %arg9[%c0_87, %c0_88], %275 {strides = array<i32>} : memref<8x64xf32, #tpu.memory_space<vmem>>, vector<8x64xf32>,
    } else {
    }
    %c0 = arith.constant 0 : index
    %c0_1 = arith.constant 0 : index
    %3 = vector.load %arg1[%c0, %c0_1] : memref<64x32xf32, #tpu.memory_space<vmem>>, vector<64x32xf32>
    %c0_2 = arith.constant 0 : index
    %c0_3 = arith.constant 0 : index
    %4 = vector.load %arg2[%c0_2, %c0_3] : memref<32x512xf32, #tpu.memory_space<vmem>>, vector<32x512xf32>
    %cst = arith.constant dense<0.000000e+00> : vector<64x512xf32>
    %5 = tpu.matmul %3, %4, %cst {dimension_numbers = #tpu.dot_dimension_numbers<[1], [0], [0], [1], [0, 0, 1, 1], [], []>} : vector<64x32xf32>, vector<32x512xf32>, vector<64x512xf32> -> vector<64x512xf32>
    %c0_4 = arith.constant 0 : index
    %c0_5 = arith.constant 0 : index
    %6 = vector.load %arg4[%c0_4, %c0_5] : memref<1x512xf32, #tpu.memory_space<vmem>>, vector<1x512xf32>
    %7 = vector.broadcast %6 : vector<1x512xf32> to vector<64x512xf32>
    %8 = arith.addf %5, %7 : vector<64x512xf32>
    %c0_6 = arith.constant 0 : index
    %c0_7 = arith.constant 0 : index
    %9 = vector.load %arg10[%c0_6, %c0_7] : memref<64x512xf32, #tpu.memory_space<vmem>>, vector<64x512xf32>
    tpu.vector_store %arg10[%c0_6, %c0_7], %8 {strides = array<i32>} : memref<64x512xf32, #tpu.memory_space<vmem>>, vector<64x512xf32>,
    %c0_8 = arith.constant 0 : index
    %c0_9 = arith.constant 0 : index
    %10 = vector.load %arg8[%c0_8, %c0_9] : memref<8x64xf32, #tpu.memory_space<vmem>>, vector<8x64xf32>
    %c0_10 = arith.constant 0 : index
    %c0_11 = arith.constant 0 : index
    %11 = vector.load %arg9[%c0_10, %c0_11] : memref<8x64xf32, #tpu.memory_space<vmem>>, vector<8x64xf32>
    %c0_i32_12 = arith.constant 0 : i32
    %c8_i32 = arith.constant 8 : i32
    %12 = arith.muli %c0_i32_12, %c8_i32 : i32
    %13 = tpu.assume_multiple %12, 8 : i32
    %14 = arith.index_cast %13 : i32 to index
    %c0_13 = arith.constant 0 : index
    %15 = vector.load %arg10[%14, %c0_13] : memref<64x512xf32, #tpu.memory_space<vmem>>, vector<8x512xf32>
    %c0_14 = arith.constant 0 : index
    %c0_15 = arith.constant 0 : index
    %16 = vector.load %arg3[%c0_14, %c0_15] : memref<64x512xf32, #tpu.memory_space<vmem>>, vector<64x512xf32>
    %cst_16 = arith.constant dense<0.000000e+00> : vector<8x512xf32>
    %17 = tpu.matmul %10, %16, %cst_16 {dimension_numbers = #tpu.dot_dimension_numbers<[1], [0], [0], [1], [0, 0, 1, 1], [], []>} : vector<8x64xf32>, vector<64x512xf32>, vector<8x512xf32> -> vector<8x512xf32>
    %18 = arith.addf %15, %17 : vector<8x512xf32>
    %19 = vector.extract_strided_slice %18 {offsets = [0, 0], sizes = [8, 64], strides = [1, 1]} : vector<8x512xf32> to vector<8x64xf32>
    %20 = arith.negf %19 : vector<8x64xf32>
    %21 = math.exp %20 : vector<8x64xf32>
    %cst_17 = arith.constant 1.000000e+00 : f32
    %22 = vector.broadcast %cst_17 : f32 to vector<8x64xf32>
    %23 = arith.addf %22, %21 : vector<8x64xf32>
    %24 = arith.divf %22, %23 : vector<8x64xf32>
    %25 = vector.extract_strided_slice %18 {offsets = [0, 128], sizes = [8, 64], strides = [1, 1]} : vector<8x512xf32> to vector<8x64xf32>
    %26 = arith.negf %25 : vector<8x64xf32>
    %27 = math.exp %26 : vector<8x64xf32>
    %cst_18 = arith.constant 1.000000e+00 : f32
    %28 = vector.broadcast %cst_18 : f32 to vector<8x64xf32>
    %29 = arith.addf %28, %27 : vector<8x64xf32>
    %30 = arith.divf %28, %29 : vector<8x64xf32>
    %31 = vector.extract_strided_slice %18 {offsets = [0, 256], sizes = [8, 64], strides = [1, 1]} : vector<8x512xf32> to vector<8x64xf32>
    %32 = math.tanh %31 : vector<8x64xf32>
    %33 = vector.extract_strided_slice %18 {offsets = [0, 384], sizes = [8, 64], strides = [1, 1]} : vector<8x512xf32> to vector<8x64xf32>
    %34 = arith.negf %33 : vector<8x64xf32>
    %35 = math.exp %34 : vector<8x64xf32>
    %cst_19 = arith.constant 1.000000e+00 : f32
    %36 = vector.broadcast %cst_19 : f32 to vector<8x64xf32>
    %37 = arith.addf %36, %35 : vector<8x64xf32>
    %38 = arith.divf %36, %37 : vector<8x64xf32>
    %39 = arith.mulf %30, %11 : vector<8x64xf32>
    %40 = arith.mulf %24, %32 : vector<8x64xf32>
    %41 = arith.addf %39, %40 : vector<8x64xf32>
    %42 = math.tanh %41 : vector<8x64xf32>
    %43 = arith.mulf %38, %42 : vector<8x64xf32>
    %c1_i32 = arith.constant 1 : i32
    %c8_i32_20 = arith.constant 8 : i32
    %44 = arith.muli %c1_i32, %c8_i32_20 : i32
    %45 = tpu.assume_multiple %44, 8 : i32
    %46 = arith.index_cast %45 : i32 to index
    %c0_21 = arith.constant 0 : index
    %47 = vector.load %arg10[%46, %c0_21] : memref<64x512xf32, #tpu.memory_space<vmem>>, vector<8x512xf32>
    %c0_22 = arith.constant 0 : index
    %c0_23 = arith.constant 0 : index
    %48 = vector.load %arg3[%c0_22, %c0_23] : memref<64x512xf32, #tpu.memory_space<vmem>>, vector<64x512xf32>
    %cst_24 = arith.constant dense<0.000000e+00> : vector<8x512xf32>
    %49 = tpu.matmul %43, %48, %cst_24 {dimension_numbers = #tpu.dot_dimension_numbers<[1], [0], [0], [1], [0, 0, 1, 1], [], []>} : vector<8x64xf32>, vector<64x512xf32>, vector<8x512xf32> -> vector<8x512xf32>
    %50 = arith.addf %47, %49 : vector<8x512xf32>
    %51 = vector.extract_strided_slice %50 {offsets = [0, 0], sizes = [8, 64], strides = [1, 1]} : vector<8x512xf32> to vector<8x64xf32>
    %52 = arith.negf %51 : vector<8x64xf32>
    %53 = math.exp %52 : vector<8x64xf32>
    %cst_25 = arith.constant 1.000000e+00 : f32
    %54 = vector.broadcast %cst_25 : f32 to vector<8x64xf32>
    %55 = arith.addf %54, %53 : vector<8x64xf32>
    %56 = arith.divf %54, %55 : vector<8x64xf32>
    %57 = vector.extract_strided_slice %50 {offsets = [0, 128], sizes = [8, 64], strides = [1, 1]} : vector<8x512xf32> to vector<8x64xf32>
    %58 = arith.negf %57 : vector<8x64xf32>
    %59 = math.exp %58 : vector<8x64xf32>
    %cst_26 = arith.constant 1.000000e+00 : f32
    %60 = vector.broadcast %cst_26 : f32 to vector<8x64xf32>
    %61 = arith.addf %60, %59 : vector<8x64xf32>
    %62 = arith.divf %60, %61 : vector<8x64xf32>
    %63 = vector.extract_strided_slice %50 {offsets = [0, 256], sizes = [8, 64], strides = [1, 1]} : vector<8x512xf32> to vector<8x64xf32>
    %64 = math.tanh %63 : vector<8x64xf32>
    %65 = vector.extract_strided_slice %50 {offsets = [0, 384], sizes = [8, 64], strides = [1, 1]} : vector<8x512xf32> to vector<8x64xf32>
    %66 = arith.negf %65 : vector<8x64xf32>
    %67 = math.exp %66 : vector<8x64xf32>
    %cst_27 = arith.constant 1.000000e+00 : f32
    %68 = vector.broadcast %cst_27 : f32 to vector<8x64xf32>
    %69 = arith.addf %68, %67 : vector<8x64xf32>
    %70 = arith.divf %68, %69 : vector<8x64xf32>
    %71 = arith.mulf %62, %41 : vector<8x64xf32>
    %72 = arith.mulf %56, %64 : vector<8x64xf32>
    %73 = arith.addf %71, %72 : vector<8x64xf32>
    %74 = math.tanh %73 : vector<8x64xf32>
    %75 = arith.mulf %70, %74 : vector<8x64xf32>
    %c2_i32 = arith.constant 2 : i32
    %c8_i32_28 = arith.constant 8 : i32
    %76 = arith.muli %c2_i32, %c8_i32_28 : i32
    %77 = tpu.assume_multiple %76, 8 : i32
    %78 = arith.index_cast %77 : i32 to index
    %c0_29 = arith.constant 0 : index
    %79 = vector.load %arg10[%78, %c0_29] : memref<64x512xf32, #tpu.memory_space<vmem>>, vector<8x512xf32>
    %c0_30 = arith.constant 0 : index
    %c0_31 = arith.constant 0 : index
    %80 = vector.load %arg3[%c0_30, %c0_31] : memref<64x512xf32, #tpu.memory_space<vmem>>, vector<64x512xf32>
    %cst_32 = arith.constant dense<0.000000e+00> : vector<8x512xf32>
    %81 = tpu.matmul %75, %80, %cst_32 {dimension_numbers = #tpu.dot_dimension_numbers<[1], [0], [0], [1], [0, 0, 1, 1], [], []>} : vector<8x64xf32>, vector<64x512xf32>, vector<8x512xf32> -> vector<8x512xf32>
    %82 = arith.addf %79, %81 : vector<8x512xf32>
    %83 = vector.extract_strided_slice %82 {offsets = [0, 0], sizes = [8, 64], strides = [1, 1]} : vector<8x512xf32> to vector<8x64xf32>
    %84 = arith.negf %83 : vector<8x64xf32>
    %85 = math.exp %84 : vector<8x64xf32>
    %cst_33 = arith.constant 1.000000e+00 : f32
    %86 = vector.broadcast %cst_33 : f32 to vector<8x64xf32>
    %87 = arith.addf %86, %85 : vector<8x64xf32>
    %88 = arith.divf %86, %87 : vector<8x64xf32>
    %89 = vector.extract_strided_slice %82 {offsets = [0, 128], sizes = [8, 64], strides = [1, 1]} : vector<8x512xf32> to vector<8x64xf32>
    %90 = arith.negf %89 : vector<8x64xf32>
    %91 = math.exp %90 : vector<8x64xf32>
    %cst_34 = arith.constant 1.000000e+00 : f32
    %92 = vector.broadcast %cst_34 : f32 to vector<8x64xf32>
    %93 = arith.addf %92, %91 : vector<8x64xf32>
    %94 = arith.divf %92, %93 : vector<8x64xf32>
    %95 = vector.extract_strided_slice %82 {offsets = [0, 256], sizes = [8, 64], strides = [1, 1]} : vector<8x512xf32> to vector<8x64xf32>
    %96 = math.tanh %95 : vector<8x64xf32>
    %97 = vector.extract_strided_slice %82 {offsets = [0, 384], sizes = [8, 64], strides = [1, 1]} : vector<8x512xf32> to vector<8x64xf32>
    %98 = arith.negf %97 : vector<8x64xf32>
    %99 = math.exp %98 : vector<8x64xf32>
    %cst_35 = arith.constant 1.000000e+00 : f32
    %100 = vector.broadcast %cst_35 : f32 to vector<8x64xf32>
    %101 = arith.addf %100, %99 : vector<8x64xf32>
    %102 = arith.divf %100, %101 : vector<8x64xf32>
    %103 = arith.mulf %94, %73 : vector<8x64xf32>
    %104 = arith.mulf %88, %96 : vector<8x64xf32>
    %105 = arith.addf %103, %104 : vector<8x64xf32>
    %106 = math.tanh %105 : vector<8x64xf32>
    %107 = arith.mulf %102, %106 : vector<8x64xf32>
    %c3_i32 = arith.constant 3 : i32
    %c8_i32_36 = arith.constant 8 : i32
    %108 = arith.muli %c3_i32, %c8_i32_36 : i32
    %109 = tpu.assume_multiple %108, 8 : i32
    %110 = arith.index_cast %109 : i32 to index
    %c0_37 = arith.constant 0 : index
    %111 = vector.load %arg10[%110, %c0_37] : memref<64x512xf32, #tpu.memory_space<vmem>>, vector<8x512xf32>
    %c0_38 = arith.constant 0 : index
    %c0_39 = arith.constant 0 : index
    %112 = vector.load %arg3[%c0_38, %c0_39] : memref<64x512xf32, #tpu.memory_space<vmem>>, vector<64x512xf32>
    %cst_40 = arith.constant dense<0.000000e+00> : vector<8x512xf32>
    %113 = tpu.matmul %107, %112, %cst_40 {dimension_numbers = #tpu.dot_dimension_numbers<[1], [0], [0], [1], [0, 0, 1, 1], [], []>} : vector<8x64xf32>, vector<64x512xf32>, vector<8x512xf32> -> vector<8x512xf32>
    %114 = arith.addf %111, %113 : vector<8x512xf32>
    %115 = vector.extract_strided_slice %114 {offsets = [0, 0], sizes = [8, 64], strides = [1, 1]} : vector<8x512xf32> to vector<8x64xf32>
    %116 = arith.negf %115 : vector<8x64xf32>
    %117 = math.exp %116 : vector<8x64xf32>
    %cst_41 = arith.constant 1.000000e+00 : f32
    %118 = vector.broadcast %cst_41 : f32 to vector<8x64xf32>
    %119 = arith.addf %118, %117 : vector<8x64xf32>
    %120 = arith.divf %118, %119 : vector<8x64xf32>
    %121 = vector.extract_strided_slice %114 {offsets = [0, 128], sizes = [8, 64], strides = [1, 1]} : vector<8x512xf32> to vector<8x64xf32>
    %122 = arith.negf %121 : vector<8x64xf32>
    %123 = math.exp %122 : vector<8x64xf32>
    %cst_42 = arith.constant 1.000000e+00 : f32
    %124 = vector.broadcast %cst_42 : f32 to vector<8x64xf32>
    %125 = arith.addf %124, %123 : vector<8x64xf32>
    %126 = arith.divf %124, %125 : vector<8x64xf32>
    %127 = vector.extract_strided_slice %114 {offsets = [0, 256], sizes = [8, 64], strides = [1, 1]} : vector<8x512xf32> to vector<8x64xf32>
    %128 = math.tanh %127 : vector<8x64xf32>
    %129 = vector.extract_strided_slice %114 {offsets = [0, 384], sizes = [8, 64], strides = [1, 1]} : vector<8x512xf32> to vector<8x64xf32>
    %130 = arith.negf %129 : vector<8x64xf32>
    %131 = math.exp %130 : vector<8x64xf32>
    %cst_43 = arith.constant 1.000000e+00 : f32
    %132 = vector.broadcast %cst_43 : f32 to vector<8x64xf32>
    %133 = arith.addf %132, %131 : vector<8x64xf32>
    %134 = arith.divf %132, %133 : vector<8x64xf32>
    %135 = arith.mulf %126, %105 : vector<8x64xf32>
    %136 = arith.mulf %120, %128 : vector<8x64xf32>
    %137 = arith.addf %135, %136 : vector<8x64xf32>
    %138 = math.tanh %137 : vector<8x64xf32>
    %139 = arith.mulf %134, %138 : vector<8x64xf32>
    %c4_i32 = arith.constant 4 : i32
    %c8_i32_44 = arith.constant 8 : i32
    %140 = arith.muli %c4_i32, %c8_i32_44 : i32
    %141 = tpu.assume_multiple %140, 8 : i32
    %142 = arith.index_cast %141 : i32 to index
    %c0_45 = arith.constant 0 : index
    %143 = vector.load %arg10[%142, %c0_45] : memref<64x512xf32, #tpu.memory_space<vmem>>, vector<8x512xf32>
    %c0_46 = arith.constant 0 : index
    %c0_47 = arith.constant 0 : index
    %144 = vector.load %arg3[%c0_46, %c0_47] : memref<64x512xf32, #tpu.memory_space<vmem>>, vector<64x512xf32>
    %cst_48 = arith.constant dense<0.000000e+00> : vector<8x512xf32>
    %145 = tpu.matmul %139, %144, %cst_48 {dimension_numbers = #tpu.dot_dimension_numbers<[1], [0], [0], [1], [0, 0, 1, 1], [], []>} : vector<8x64xf32>, vector<64x512xf32>, vector<8x512xf32> -> vector<8x512xf32>
    %146 = arith.addf %143, %145 : vector<8x512xf32>
    %147 = vector.extract_strided_slice %146 {offsets = [0, 0], sizes = [8, 64], strides = [1, 1]} : vector<8x512xf32> to vector<8x64xf32>
    %148 = arith.negf %147 : vector<8x64xf32>
    %149 = math.exp %148 : vector<8x64xf32>
    %cst_49 = arith.constant 1.000000e+00 : f32
    %150 = vector.broadcast %cst_49 : f32 to vector<8x64xf32>
    %151 = arith.addf %150, %149 : vector<8x64xf32>
    %152 = arith.divf %150, %151 : vector<8x64xf32>
    %153 = vector.extract_strided_slice %146 {offsets = [0, 128], sizes = [8, 64], strides = [1, 1]} : vector<8x512xf32> to vector<8x64xf32>
    %154 = arith.negf %153 : vector<8x64xf32>
    %155 = math.exp %154 : vector<8x64xf32>
    %cst_50 = arith.constant 1.000000e+00 : f32
    %156 = vector.broadcast %cst_50 : f32 to vector<8x64xf32>
    %157 = arith.addf %156, %155 : vector<8x64xf32>
    %158 = arith.divf %156, %157 : vector<8x64xf32>
    %159 = vector.extract_strided_slice %146 {offsets = [0, 256], sizes = [8, 64], strides = [1, 1]} : vector<8x512xf32> to vector<8x64xf32>
    %160 = math.tanh %159 : vector<8x64xf32>
    %161 = vector.extract_strided_slice %146 {offsets = [0, 384], sizes = [8, 64], strides = [1, 1]} : vector<8x512xf32> to vector<8x64xf32>
    %162 = arith.negf %161 : vector<8x64xf32>
    %163 = math.exp %162 : vector<8x64xf32>
    %cst_51 = arith.constant 1.000000e+00 : f32
    %164 = vector.broadcast %cst_51 : f32 to vector<8x64xf32>
    %165 = arith.addf %164, %163 : vector<8x64xf32>
    %166 = arith.divf %164, %165 : vector<8x64xf32>
    %167 = arith.mulf %158, %137 : vector<8x64xf32>
    %168 = arith.mulf %152, %160 : vector<8x64xf32>
    %169 = arith.addf %167, %168 : vector<8x64xf32>
    %170 = math.tanh %169 : vector<8x64xf32>
    %171 = arith.mulf %166, %170 : vector<8x64xf32>
    %c5_i32 = arith.constant 5 : i32
    %c8_i32_52 = arith.constant 8 : i32
    %172 = arith.muli %c5_i32, %c8_i32_52 : i32
    %173 = tpu.assume_multiple %172, 8 : i32
    %174 = arith.index_cast %173 : i32 to index
    %c0_53 = arith.constant 0 : index
    %175 = vector.load %arg10[%174, %c0_53] : memref<64x512xf32, #tpu.memory_space<vmem>>, vector<8x512xf32>
    %c0_54 = arith.constant 0 : index
    %c0_55 = arith.constant 0 : index
    %176 = vector.load %arg3[%c0_54, %c0_55] : memref<64x512xf32, #tpu.memory_space<vmem>>, vector<64x512xf32>
    %cst_56 = arith.constant dense<0.000000e+00> : vector<8x512xf32>
    %177 = tpu.matmul %171, %176, %cst_56 {dimension_numbers = #tpu.dot_dimension_numbers<[1], [0], [0], [1], [0, 0, 1, 1], [], []>} : vector<8x64xf32>, vector<64x512xf32>, vector<8x512xf32> -> vector<8x512xf32>
    %178 = arith.addf %175, %177 : vector<8x512xf32>
    %179 = vector.extract_strided_slice %178 {offsets = [0, 0], sizes = [8, 64], strides = [1, 1]} : vector<8x512xf32> to vector<8x64xf32>
    %180 = arith.negf %179 : vector<8x64xf32>
    %181 = math.exp %180 : vector<8x64xf32>
    %cst_57 = arith.constant 1.000000e+00 : f32
    %182 = vector.broadcast %cst_57 : f32 to vector<8x64xf32>
    %183 = arith.addf %182, %181 : vector<8x64xf32>
    %184 = arith.divf %182, %183 : vector<8x64xf32>
    %185 = vector.extract_strided_slice %178 {offsets = [0, 128], sizes = [8, 64], strides = [1, 1]} : vector<8x512xf32> to vector<8x64xf32>
    %186 = arith.negf %185 : vector<8x64xf32>
    %187 = math.exp %186 : vector<8x64xf32>
    %cst_58 = arith.constant 1.000000e+00 : f32
    %188 = vector.broadcast %cst_58 : f32 to vector<8x64xf32>
    %189 = arith.addf %188, %187 : vector<8x64xf32>
    %190 = arith.divf %188, %189 : vector<8x64xf32>
    %191 = vector.extract_strided_slice %178 {offsets = [0, 256], sizes = [8, 64], strides = [1, 1]} : vector<8x512xf32> to vector<8x64xf32>
    %192 = math.tanh %191 : vector<8x64xf32>
    %193 = vector.extract_strided_slice %178 {offsets = [0, 384], sizes = [8, 64], strides = [1, 1]} : vector<8x512xf32> to vector<8x64xf32>
    %194 = arith.negf %193 : vector<8x64xf32>
    %195 = math.exp %194 : vector<8x64xf32>
    %cst_59 = arith.constant 1.000000e+00 : f32
    %196 = vector.broadcast %cst_59 : f32 to vector<8x64xf32>
    %197 = arith.addf %196, %195 : vector<8x64xf32>
    %198 = arith.divf %196, %197 : vector<8x64xf32>
    %199 = arith.mulf %190, %169 : vector<8x64xf32>
    %200 = arith.mulf %184, %192 : vector<8x64xf32>
    %201 = arith.addf %199, %200 : vector<8x64xf32>
    %202 = math.tanh %201 : vector<8x64xf32>
    %203 = arith.mulf %198, %202 : vector<8x64xf32>
    %c6_i32 = arith.constant 6 : i32
    %c8_i32_60 = arith.constant 8 : i32
    %204 = arith.muli %c6_i32, %c8_i32_60 : i32
    %205 = tpu.assume_multiple %204, 8 : i32
    %206 = arith.index_cast %205 : i32 to index
    %c0_61 = arith.constant 0 : index
    %207 = vector.load %arg10[%206, %c0_61] : memref<64x512xf32, #tpu.memory_space<vmem>>, vector<8x512xf32>
    %c0_62 = arith.constant 0 : index
    %c0_63 = arith.constant 0 : index
    %208 = vector.load %arg3[%c0_62, %c0_63] : memref<64x512xf32, #tpu.memory_space<vmem>>, vector<64x512xf32>
    %cst_64 = arith.constant dense<0.000000e+00> : vector<8x512xf32>
    %209 = tpu.matmul %203, %208, %cst_64 {dimension_numbers = #tpu.dot_dimension_numbers<[1], [0], [0], [1], [0, 0, 1, 1], [], []>} : vector<8x64xf32>, vector<64x512xf32>, vector<8x512xf32> -> vector<8x512xf32>
    %210 = arith.addf %207, %209 : vector<8x512xf32>
    %211 = vector.extract_strided_slice %210 {offsets = [0, 0], sizes = [8, 64], strides = [1, 1]} : vector<8x512xf32> to vector<8x64xf32>
    %212 = arith.negf %211 : vector<8x64xf32>
    %213 = math.exp %212 : vector<8x64xf32>
    %cst_65 = arith.constant 1.000000e+00 : f32
    %214 = vector.broadcast %cst_65 : f32 to vector<8x64xf32>
    %215 = arith.addf %214, %213 : vector<8x64xf32>
    %216 = arith.divf %214, %215 : vector<8x64xf32>
    %217 = vector.extract_strided_slice %210 {offsets = [0, 128], sizes = [8, 64], strides = [1, 1]} : vector<8x512xf32> to vector<8x64xf32>
    %218 = arith.negf %217 : vector<8x64xf32>
    %219 = math.exp %218 : vector<8x64xf32>
    %cst_66 = arith.constant 1.000000e+00 : f32
    %220 = vector.broadcast %cst_66 : f32 to vector<8x64xf32>
    %221 = arith.addf %220, %219 : vector<8x64xf32>
    %222 = arith.divf %220, %221 : vector<8x64xf32>
    %223 = vector.extract_strided_slice %210 {offsets = [0, 256], sizes = [8, 64], strides = [1, 1]} : vector<8x512xf32> to vector<8x64xf32>
    %224 = math.tanh %223 : vector<8x64xf32>
    %225 = vector.extract_strided_slice %210 {offsets = [0, 384], sizes = [8, 64], strides = [1, 1]} : vector<8x512xf32> to vector<8x64xf32>
    %226 = arith.negf %225 : vector<8x64xf32>
    %227 = math.exp %226 : vector<8x64xf32>
    %cst_67 = arith.constant 1.000000e+00 : f32
    %228 = vector.broadcast %cst_67 : f32 to vector<8x64xf32>
    %229 = arith.addf %228, %227 : vector<8x64xf32>
    %230 = arith.divf %228, %229 : vector<8x64xf32>
    %231 = arith.mulf %222, %201 : vector<8x64xf32>
    %232 = arith.mulf %216, %224 : vector<8x64xf32>
    %233 = arith.addf %231, %232 : vector<8x64xf32>
    %234 = math.tanh %233 : vector<8x64xf32>
    %235 = arith.mulf %230, %234 : vector<8x64xf32>
    %c7_i32 = arith.constant 7 : i32
    %c8_i32_68 = arith.constant 8 : i32
    %236 = arith.muli %c7_i32, %c8_i32_68 : i32
    %237 = tpu.assume_multiple %236, 8 : i32
    %238 = arith.index_cast %237 : i32 to index
    %c0_69 = arith.constant 0 : index
    %239 = vector.load %arg10[%238, %c0_69] : memref<64x512xf32, #tpu.memory_space<vmem>>, vector<8x512xf32>
    %c0_70 = arith.constant 0 : index
    %c0_71 = arith.constant 0 : index
    %240 = vector.load %arg3[%c0_70, %c0_71] : memref<64x512xf32, #tpu.memory_space<vmem>>, vector<64x512xf32>
    %cst_72 = arith.constant dense<0.000000e+00> : vector<8x512xf32>
    %241 = tpu.matmul %235, %240, %cst_72 {dimension_numbers = #tpu.dot_dimension_numbers<[1], [0], [0], [1], [0, 0, 1, 1], [], []>} : vector<8x64xf32>, vector<64x512xf32>, vector<8x512xf32> -> vector<8x512xf32>
    %242 = arith.addf %239, %241 : vector<8x512xf32>
    %243 = vector.extract_strided_slice %242 {offsets = [0, 0], sizes = [8, 64], strides = [1, 1]} : vector<8x512xf32> to vector<8x64xf32>
    %244 = arith.negf %243 : vector<8x64xf32>
    %245 = math.exp %244 : vector<8x64xf32>
    %cst_73 = arith.constant 1.000000e+00 : f32
    %246 = vector.broadcast %cst_73 : f32 to vector<8x64xf32>
    %247 = arith.addf %246, %245 : vector<8x64xf32>
    %248 = arith.divf %246, %247 : vector<8x64xf32>
    %249 = vector.extract_strided_slice %242 {offsets = [0, 128], sizes = [8, 64], strides = [1, 1]} : vector<8x512xf32> to vector<8x64xf32>
    %250 = arith.negf %249 : vector<8x64xf32>
    %251 = math.exp %250 : vector<8x64xf32>
    %cst_74 = arith.constant 1.000000e+00 : f32
    %252 = vector.broadcast %cst_74 : f32 to vector<8x64xf32>
    %253 = arith.addf %252, %251 : vector<8x64xf32>
    %254 = arith.divf %252, %253 : vector<8x64xf32>
    %255 = vector.extract_strided_slice %242 {offsets = [0, 256], sizes = [8, 64], strides = [1, 1]} : vector<8x512xf32> to vector<8x64xf32>
    %256 = math.tanh %255 : vector<8x64xf32>
    %257 = vector.extract_strided_slice %242 {offsets = [0, 384], sizes = [8, 64], strides = [1, 1]} : vector<8x512xf32> to vector<8x64xf32>
    %258 = arith.negf %257 : vector<8x64xf32>
    %259 = math.exp %258 : vector<8x64xf32>
    %cst_75 = arith.constant 1.000000e+00 : f32
    %260 = vector.broadcast %cst_75 : f32 to vector<8x64xf32>
    %261 = arith.addf %260, %259 : vector<8x64xf32>
    %262 = arith.divf %260, %261 : vector<8x64xf32>
    %263 = arith.mulf %254, %233 : vector<8x64xf32>
    %264 = arith.mulf %248, %256 : vector<8x64xf32>
    %265 = arith.addf %263, %264 : vector<8x64xf32>
    %266 = math.tanh %265 : vector<8x64xf32>
    %267 = arith.mulf %262, %266 : vector<8x64xf32>
    %c8_i32_76 = arith.constant 8 : i32
    %c0_77 = arith.constant 0 : index
    %c0_78 = arith.constant 0 : index
    %268 = vector.load %arg8[%c0_77, %c0_78] : memref<8x64xf32, #tpu.memory_space<vmem>>, vector<8x64xf32>
    tpu.vector_store %arg8[%c0_77, %c0_78], %267 {strides = array<i32>} : memref<8x64xf32, #tpu.memory_space<vmem>>, vector<8x64xf32>,
    %c0_79 = arith.constant 0 : index
    %c0_80 = arith.constant 0 : index
    %269 = vector.load %arg9[%c0_79, %c0_80] : memref<8x64xf32, #tpu.memory_space<vmem>>, vector<8x64xf32>
    tpu.vector_store %arg9[%c0_79, %c0_80], %265 {strides = array<i32>} : memref<8x64xf32, #tpu.memory_space<vmem>>, vector<8x64xf32>,
    %c0_i32_81 = arith.constant 0 : i32
    %270 = arith.cmpi eq, %arg0, %c0_i32_81 : i32
    %271 = arith.extui %270 : i1 to i32
    %c0_i32_82 = arith.constant 0 : i32
    %272 = arith.cmpi ne, %271, %c0_i32_82 : i32
    scf.if %272 {
      %c0_83 = arith.constant 0 : index
      %c0_84 = arith.constant 0 : index
      %273 = vector.load %arg5[%c0_83, %c0_84] : memref<64x128xf32, #tpu.memory_space<vmem>>, vector<64x128xf32>
      %cst_85 = arith.constant dense<0.000000e+00> : vector<8x128xf32>
      %274 = tpu.matmul %267, %273, %cst_85 {dimension_numbers = #tpu.dot_dimension_numbers<[1], [0], [0], [1], [0, 0, 1, 1], [], []>} : vector<8x64xf32>, vector<64x128xf32>, vector<8x128xf32> -> vector<8x128xf32>
      %c0_86 = arith.constant 0 : index
      %c0_87 = arith.constant 0 : index
      %275 = vector.load %arg6[%c0_86, %c0_87] : memref<1x128xf32, #tpu.memory_space<vmem>>, vector<1x128xf32>
      %276 = vector.broadcast %275 : vector<1x128xf32> to vector<8x128xf32>
      %277 = arith.addf %274, %276 : vector<8x128xf32>
      %c0_88 = arith.constant 0 : index
      %c0_89 = arith.constant 0 : index
      %278 = vector.load %arg7[%c0_88, %c0_89] : memref<8x128xf32, #tpu.memory_space<vmem>>, vector<8x128xf32>
      tpu.vector_store %arg7[%c0_88, %c0_89], %277 {strides = array<i32>} : memref<8x128xf32, #tpu.memory_space<vmem>>, vector<8x128xf32>,
    } else {
    }
    return
  }
  func.func @transform_0(%arg0: i32) -> (i32, i32) {
    %c0_i32 = arith.constant 0 : i32
    %c0_i32_0 = arith.constant 0 : i32
    return %arg0, %c0_i32 : i32, i32
  }
  func.func @transform_1(%arg0: i32) -> (i32, i32) {
    %c0_i32 = arith.constant 0 : i32
    %c0_i32_0 = arith.constant 0 : i32
    %c0_i32_1 = arith.constant 0 : i32
    return %c0_i32, %c0_i32_0 : i32, i32
  }
  func.func @transform_2(%arg0: i32) -> (i32, i32) {
    %c0_i32 = arith.constant 0 : i32
    %c0_i32_0 = arith.constant 0 : i32
    %c0_i32_1 = arith.constant 0 : i32
    return %c0_i32, %c0_i32_0 : i32, i32
  }
  func.func @transform_3(%arg0: i32) -> (i32, i32) {
    %c0_i32 = arith.constant 0 : i32
    %c0_i32_0 = arith.constant 0 : i32
    %c0_i32_1 = arith.constant 0 : i32
    return %c0_i32, %c0_i32_0 : i32, i32
  }
  func.func @transform_4(%arg0: i32) -> (i32, i32) {
    %c0_i32 = arith.constant 0 : i32
    %c0_i32_0 = arith.constant 0 : i32
    %c0_i32_1 = arith.constant 0 : i32
    return %c0_i32, %c0_i32_0 : i32, i32
  }
  func.func @transform_5(%arg0: i32) -> (i32, i32) {
    %c0_i32 = arith.constant 0 : i32
    %c0_i32_0 = arith.constant 0 : i32
    %c0_i32_1 = arith.constant 0 : i32
    return %c0_i32, %c0_i32_0 : i32, i32
  }
  func.func @transform_6(%arg0: i32) -> (i32, i32) {
    %c0_i32 = arith.constant 0 : i32
    %c0_i32_0 = arith.constant 0 : i32
    %c0_i32_1 = arith.constant 0 : i32
    return %c0_i32, %c0_i32_0 : i32, i32
  }
}

</mosaic_0001>

<bundles_post_ra>
// kernel: stack_rnn_forward.1
= control target key start
LH: loop header
LB: loop body
LE: loop exit
PB: predicated region body
PF: predicated region fallthrough
CT: control target
= control target key end

     0   :  { %vm27_vm0 = vcmask 523264   ;;  %v3050_v3 = vmov 0.0   ;;  %vm76_vm1 = vcmask 261120   ;;  %v56_v58 = vlaneseq  ;;  %s3043_s1 = inlined_call_operand.vmem [shape: f32[32,512], index: 1, kind: input, shape index: {}]   ;;  %s3044_s0 = inlined_call_operand.vmem [shape: f32[64,32], index: 0, kind: input, shape index: {}]   ;;  %s3045_s2 = inlined_call_operand.vmem [shape: f32[64,512], index: 2, kind: input, shape index: {}]   ;;  %s3046_s3 = inlined_call_operand.vmem [shape: f32[1,512], index: 3, kind: input, shape index: {}]   ;;  %s3047_s4 = inlined_call_operand.vmem [shape: f32[64,128], index: 4, kind: input, shape index: {}]   ;;  %s3048_s5 = inlined_call_operand.vmem [shape: f32[1,128], index: 5, kind: input, shape index: {}]   ;;  %s3049_s6 = inlined_call_operand.vmem [shape: f32[8,128], index: 6, kind: output, shape index: {}]  }
   0x1   :  { %v51_v0 = vld [vmem:[%s3043_s1 + $0x68] sm:$0xff]  ;;  %v50_v1 = vld [vmem:[%s3043_s1 + $0x60] sm:$0xff]  ;;  %165 = vmatprep.mubr.f32.mxu0 %v3050_v3  ;;  %201 = vmatprep.mubr.f32.mxu1 %v3050_v3  ;;  %28 = vst.msk [vmem:[#allocation2] sm:$0xff] %vm27_vm0, %v3050_v3  ;;  %29 = vst.msk [vmem:[#allocation3] sm:$0xff] %vm27_vm0, %v3050_v3  ;;  %vm2196_vm2 = vmmov 0  }
   0x2   :  { %v47_v2 = vld [vmem:[%s3043_s1 + $0x48] sm:$0xff]  ;;  %125 = vmatprep.subr.mxu0 %v51_v0  ;;  %2025 = vmatprep.subr.mxu1 %v51_v0  ;;  %v46_v4 = vld [vmem:[%s3043_s1 + $0x40] sm:$0xff]  ;;  %v2268_v10 = vld [vmem:[%s3044_s0 + $0x30] sm:$0xff]  ;;  %v57_v59 = vshrl.u32 %v56_v58, 7 }
   0x3   :  { %126 = vmatpush1.msra.mxu0 %v50_v1  ;;  %2029 = vmatpush1.msra.mxu1 %v50_v1  ;;  %v43_v5 = vld [vmem:[%s3043_s1 + $0x28] sm:$0xff]  ;;  %v42_v6 = vld [vmem:[%s3043_s1 + $0x20] sm:$0xff]  ;;  %v53_v11 = vld [vmem:[%s3043_s1 + $0x78] sm:$0xff] }
   0x4   :  { %127 = vmatprep.subr.mxu0 %v47_v2  ;;  %2026 = vmatprep.subr.mxu1 %v47_v2  ;;  %v39_v7 = vld [vmem:[%s3043_s1 + $0x8] sm:$0xff]  ;;  %v38_v8 = vld [vmem:[%s3043_s1] sm:$0xff]  ;;  %v52_v13 = vld [vmem:[%s3043_s1 + $0x70] sm:$0xff]  ;;  %v58_v60 = vsub.s32 0, %v57_v59  ;;  %v62_v61 = vsub.s32 1, %v57_v59 }
   0x5   :  { %128 = vmatpush1.msra.mxu0 %v46_v4  ;;  %2030 = vmatpush1.msra.mxu1 %v46_v4  ;;  %v30_v9 = vld [vmem:[%s3044_s0] sm:$0xff]  ;;  %v2276_v12 = vld [vmem:[%s3045_s2 + $0xe8] sm:$0xff]  ;;  %v49_v15 = vld [vmem:[%s3043_s1 + $0x58] sm:$0xff] }
   0x6   :  { %129 = vmatprep.subr.mxu0 %v43_v5  ;;  %2027 = vmatprep.subr.mxu1 %v43_v5  ;;  %v2284_v14 = vld [vmem:[%s3045_s2 + $0xe0] sm:$0xff]  ;;  %v48_v16 = vld [vmem:[%s3043_s1 + $0x50] sm:$0xff]  ;;  %v2300_v17 = vld [vmem:[%s3045_s2 + $0xc8] sm:$0xff] }
   0x7   :  { %130 = vmatpush1.msra.mxu0 %v42_v6  ;;  %2031 = vmatpush1.msra.mxu1 %v42_v6  ;;  %v31_v18 = vld [vmem:[%s3044_s0 + $0x8] sm:$0xff]  ;;  %v2309_v19 = vld [vmem:[%s3044_s0 + $0x38] sm:$0xff]  ;;  %v2318_v21 = vld [vmem:[%s3045_s2 + $0xc0] sm:$0xff] }
   0x8   :  { %131 = vmatprep.subr.mxu0 %v39_v7  ;;  %2028 = vmatprep.subr.mxu1 %v39_v7  ;;  %v45_v20 = vld [vmem:[%s3043_s1 + $0x38] sm:$0xff]  ;;  %v44_v22 = vld [vmem:[%s3043_s1 + $0x30] sm:$0xff]  ;;  %v2331_v24 = vld [vmem:[%s3045_s2 + $0xa8] sm:$0xff] }
   0x9   :  { %132 = vmatpush1.msra.mxu0 %v38_v8  ;;  %2032 = vmatpush1.msra.mxu1 %v38_v8  ;;  %v41_v23 = vld [vmem:[%s3043_s1 + $0x18] sm:$0xff]  ;;  %v40_v25 = vld [vmem:[%s3043_s1 + $0x10] sm:$0xff]  ;;  %v2342_v26 = vld [vmem:[%s3045_s2 + $0xa0] sm:$0xff] }
   0xa   :  { %1939 = vmatmul.mubr.msk.f32.vlgmr.msra.gmra.mxu0 %vm76_vm1, %v30_v9  ;;  %1945 = vmatmul.mubr.msk.f32.vlgmr.msra.gmra.mxu1 %vm76_vm1, %v2268_v10  ;;  %v32_v27 = vld [vmem:[%s3044_s0 + $0x10] sm:$0xff]  ;;  %v2352_v28 = vld [vmem:[%s3045_s2 + $0x88] sm:$0xff]  ;;  %v2357_v29 = vld [vmem:[%s3045_s2 + $0xf8] sm:$0xff] }
   0xb   :  { %238 = vmatprep.subr.mxu1 %v53_v11  ;;  %420 = vmatprep.subr.mxu0 %v2276_v12  ;;  %v2364_v30 = vld [vmem:[%s3045_s2 + $0x80] sm:$0xff]  ;;  %v2371_v31 = vld [vmem:[%s3045_s2 + $0xf0] sm:$0xff]  ;;  %v33_v32 = vld [vmem:[%s3044_s0 + $0x18] sm:$0xff] }
   0xc   :  { %239 = vmatpush1.msra.mxu1 %v52_v13  ;;  %421 = vmatpush1.msra.mxu0 %v2284_v14  ;;  %v2383_v33 = vld [vmem:[%s3045_s2 + $0x68] sm:$0xff]  ;;  %v2388_v34 = vld [vmem:[%s3045_s2 + $0xd8] sm:$0xff]  ;;  %v2395_v35 = vld [vmem:[%s3045_s2 + $0x60] sm:$0xff] }
   0xd   :  { %240 = vmatprep.subr.mxu1 %v49_v15  ;;  %171 = vmatprep.mubr.f32.mxu0 %v3050_v3  ;;  %v2402_v36 = vld [vmem:[%s3045_s2 + $0x48] sm:$0xff]  ;;  %v2409_v37 = vld [vmem:[%s3045_s2 + $0xd0] sm:$0xff]  ;;  %v34_v38 = vld [vmem:[%s3044_s0 + $0x20] sm:$0xff] }
   0xe   :  { %207 = vmatprep.mubr.f32.mxu1 %v3050_v3  ;;  %241 = vmatpush1.msra.mxu1 %v48_v16  ;;  %v2419_v39 = vld [vmem:[%s3045_s2 + $0x40] sm:$0xff]  ;;  %v2426_v40 = vld [vmem:[%s3045_s2 + $0x28] sm:$0xff]  ;;  %v2431_v41 = vld [vmem:[%s3045_s2 + $0xb8] sm:$0xff] }
   0xf   :  { %422 = vmatprep.subr.mxu0 %v2300_v17  ;;  %1940 = vmatmul.mubr.msk.f32.gmra.mxu0 %vm76_vm1, %v31_v18  ;;  %v2440_v42 = vld [vmem:[%s3045_s2 + $0x20] sm:$0xff]  ;;  %v2445_v43 = vld [vmem:[%s3045_s2 + $0xb0] sm:$0xff]  ;;  %v35_v44 = vld [vmem:[%s3044_s0 + $0x28] sm:$0xff] }
  0x10   :  { %1946 = vmatmul.mubr.msk.f32.gmra.mxu1 %vm76_vm1, %v2309_v19  ;;  %242 = vmatprep.subr.mxu1 %v45_v20  ;;  %v2457_v45 = vld [vmem:[%s3045_s2 + $0x8] sm:$0xff]  ;;  %v2462_v46 = vld [vmem:[%s3045_s2 + $0x98] sm:$0xff]  ;;  %v2469_v47 = vld [vmem:[%s3045_s2] sm:$0xff] }
  0x11   :  { %423 = vmatpush1.msra.mxu0 %v2318_v21  ;;  %243 = vmatpush1.msra.mxu1 %v44_v22  ;;  %v2476_v48 = vld [vmem:[%s3045_s2 + $0x90] sm:$0xff]  ;;  %v359_v49 = vld [vmem:[#allocation2] sm:$0xff]  ;;  %v2485_v50 = vld [vmem:[%s3045_s2 + $0x78] sm:$0xff] }
  0x12   :  { %244 = vmatprep.subr.mxu1 %v41_v23  ;;  %424 = vmatprep.subr.mxu0 %v2331_v24  ;;  %v2492_v51 = vld [vmem:[%s3045_s2 + $0x70] sm:$0xff]  ;;  %v2499_v52 = vld [vmem:[%s3045_s2 + $0x58] sm:$0xff]  ;;  %v54_v62 = vld [vmem:[%s3046_s3] sm:$0xf] }
  0x13   :  { %177 = vmatprep.mubr.f32.mxu0 %v3050_v3  ;;  %245 = vmatpush1.msra.mxu1 %v40_v25  ;;  %v2507_v53 = vld [vmem:[%s3045_s2 + $0x50] sm:$0xff]  ;;  %v2514_v54 = vld [vmem:[%s3045_s2 + $0x38] sm:$0xff]  ;;  %v59_v63 = vrot.slane %v54_v62, %v58_v60  ;;  %v63_v0 = vrot.slane %v54_v62, %v62_v61  ;;  %v70_v25 = vsub.s32 3, %v57_v59 }
  0x14   :  { %278 = vmatprep.mubr.f32.mxu1 %v3050_v3  ;;  %425 = vmatpush1.msra.mxu0 %v2342_v26  ;;  %v2521_v55 = vld [vmem:[%s3045_s2 + $0x30] sm:$0xff]  ;;  %v2529_v56 = vld [vmem:[%s3045_s2 + $0x18] sm:$0xff] }
  0x15   :  { %1941 = vmatmul.mubr.msk.f32.gmra.mxu0 %vm76_vm1, %v32_v27  ;;  %1947 = vmatmul.mubr.msk.f32.vlgmr.msra.gmra.mxu1 %vm76_vm1, %v30_v9  ;;  %v2535_v57 = vld [vmem:[%s3045_s2 + $0x10] sm:$0xff]  ;;  %v71_v60 = vrot.slane %v54_v62, %v70_v25 }
  0x16   :  { %426 = vmatprep.subr.mxu0 %v2352_v28  ;;  %491 = vmatprep.subr.mxu1 %v2357_v29 }
  0x17   :  { %427 = vmatpush1.msra.mxu0 %v2364_v30  ;;  %183 = vmatprep.mubr.f32.mxu0 %v3050_v3 }
  0x18   :  { %284 = vmatprep.mubr.f32.mxu1 %v3050_v3  ;;  %492 = vmatpush1.msra.mxu1 %v2371_v31 }
  0x19   :  { %1942 = vmatmul.mubr.msk.f32.gmra.mxu0 %vm76_vm1, %v33_v32  ;;  %1948 = vmatmul.mubr.msk.f32.gmra.mxu1 %vm76_vm1, %v31_v18 }
  0x1a   :  { %428 = vmatprep.subr.mxu0 %v2383_v33  ;;  %493 = vmatprep.subr.mxu1 %v2388_v34 }
  0x1b   :  { %429 = vmatpush1.msra.mxu0 %v2395_v35  ;;  %189 = vmatprep.mubr.f32.mxu0 %v3050_v3 }
  0x1c   :  { %290 = vmatprep.mubr.f32.mxu1 %v3050_v3  ;;  %430 = vmatprep.subr.mxu0 %v2402_v36 }
  0x1d   :  { %494 = vmatpush1.msra.mxu1 %v2409_v37  ;;  %1943 = vmatmul.mubr.msk.f32.gmra.mxu0 %vm76_vm1, %v34_v38 }
  0x1e   :  { %1949 = vmatmul.mubr.msk.f32.gmra.mxu1 %vm76_vm1, %v32_v27  ;;  %431 = vmatpush1.msra.mxu0 %v2419_v39 }
  0x1f   :  { %432 = vmatprep.subr.mxu0 %v2426_v40  ;;  %495 = vmatprep.subr.mxu1 %v2431_v41 }
  0x20   :  { %195 = vmatprep.mubr.f32.mxu0 %v3050_v3  ;;  %296 = vmatprep.mubr.f32.mxu1 %v3050_v3 }
  0x21   :  { %433 = vmatpush1.msra.mxu0 %v2440_v42  ;;  %496 = vmatpush1.msra.mxu1 %v2445_v43 }
  0x22   :  { %1944 = vmatmul.mubr.msk.f32.gmra.mxu0 %vm76_vm1, %v35_v44  ;;  %1950 = vmatmul.mubr.msk.f32.gmra.mxu1 %vm76_vm1, %v33_v32 }
  0x23   :  { %434 = vmatprep.subr.mxu0 %v2457_v45  ;;  %497 = vmatprep.subr.mxu1 %v2462_v46 }
  0x24   :  { %435 = vmatpush1.msra.mxu0 %v2469_v47  ;;  %302 = vmatprep.mubr.f32.mxu1 %v3050_v3 }
  0x25   :  { %468 = vmatprep.mubr.f32.mxu0 %v3050_v3  ;;  %498 = vmatpush1.msra.mxu1 %v2476_v48 }
  0x26   :  { %1951 = vmatmul.mubr.msk.f32.gmra.mxu1 %vm76_vm1, %v34_v38  ;;  %1955 = vmatmul.mubr.msk.f32.vlgmr.msra.gmra.mxu0 %vm27_vm0, %v359_v49 }
  0x27   :  { %499 = vmatprep.subr.mxu1 %v2485_v50  ;;  %308 = vmatprep.mubr.f32.mxu1 %v3050_v3 }
  0x28   :  { %500 = vmatpush1.msra.mxu1 %v2492_v51  ;;  %600 = vmatprep.subr.mxu0 %v2276_v12 }
  0x29   :  { %501 = vmatprep.subr.mxu1 %v2499_v52  ;;  %601 = vmatpush1.msra.mxu0 %v2284_v14 }
  0x2a   :  { %1952 = vmatmul.mubr.msk.f32.gmra.mxu1 %vm76_vm1, %v35_v44  ;;  %602 = vmatprep.subr.mxu0 %v2300_v17 }
  0x2b   :  { %314 = vmatprep.mubr.f32.mxu1 %v3050_v3  ;;  %502 = vmatpush1.msra.mxu1 %v2507_v53 }
  0x2c   :  { %503 = vmatprep.subr.mxu1 %v2514_v54  ;;  %603 = vmatpush1.msra.mxu0 %v2318_v21 }
  0x2d   :  { %504 = vmatpush1.msra.mxu1 %v2521_v55  ;;  %604 = vmatprep.subr.mxu0 %v2331_v24 }
  0x2e   :  { %1953 = vmatmul.mubr.msk.f32.gmra.mxu1 %vm76_vm1, %v2268_v10  ;;  %505 = vmatprep.subr.mxu1 %v2529_v56 }
  0x2f   :  { %320 = vmatprep.mubr.f32.mxu1 %v3050_v3  ;;  %506 = vmatpush1.msra.mxu1 %v2535_v57 }
  0x30   :  { %671 = vmatprep.subr.mxu1 %v2357_v29  ;;  %605 = vmatpush1.msra.mxu0 %v2342_v26 }
  0x31   :  { %606 = vmatprep.subr.mxu0 %v2352_v28  ;;  %648 = vmatprep.mubr.f32.mxu0 %v3050_v3 }
  0x32   :  { %1954 = vmatmul.mubr.msk.f32.gmra.mxu1 %vm76_vm1, %v2309_v19  ;;  %607 = vmatpush1.msra.mxu0 %v2364_v30  ;;  %v66_v19 = vsub.s32 2, %v57_v59 }
  0x33   :  { %539 = vmatprep.mubr.f32.mxu1 %v3050_v3  ;;  %608 = vmatprep.subr.mxu0 %v2383_v33 }
  0x34   :  { %609 = vmatpush1.msra.mxu0 %v2395_v35  ;;  %v67_v38 = vrot.slane %v54_v62, %v66_v19 }
  0x35   :  { %610 = vmatprep.subr.mxu0 %v2402_v36 }
  0x36   :  { %1956 = vmatmul.mubr.msk.f32.vlgmr.msra.gmra.mxu1 %vm27_vm0, %v359_v49  ;;  %611 = vmatpush1.msra.mxu0 %v2419_v39 }
  0x37   :  { %672 = vmatpush1.msra.mxu1 %v2371_v31  ;;  %612 = vmatprep.subr.mxu0 %v2426_v40 }
  0x38   :  { %673 = vmatprep.subr.mxu1 %v2388_v34  ;;  %613 = vmatpush1.msra.mxu0 %v2440_v42 }
  0x39   :  { %674 = vmatpush1.msra.mxu1 %v2409_v37  ;;  %614 = vmatprep.subr.mxu0 %v2457_v45 }
  0x3a   :  { %675 = vmatprep.subr.mxu1 %v2431_v41  ;;  %615 = vmatpush1.msra.mxu0 %v2469_v47 }
  0x3b   :  { %676 = vmatpush1.msra.mxu1 %v2445_v43  ;;  %719 = vmatprep.mubr.f32.mxu1 %v3050_v3 }
  0x3c   :  { %677 = vmatprep.subr.mxu1 %v2462_v46  ;;  %780 = vmatprep.subr.mxu0 %v2276_v12 }
  0x3d   :  { %678 = vmatpush1.msra.mxu1 %v2476_v48 }
  0x3e   :  { %679 = vmatprep.subr.mxu1 %v2485_v50 }
  0x3f   :  { %680 = vmatpush1.msra.mxu1 %v2492_v51 }
  0x40   :  { %681 = vmatprep.subr.mxu1 %v2499_v52 }
  0x41   :  { %682 = vmatpush1.msra.mxu1 %v2507_v53 }
  0x42   :  { %683 = vmatprep.subr.mxu1 %v2514_v54 }
  0x43   :  { %684 = vmatpush1.msra.mxu1 %v2521_v55 }
  0x44   :  { %685 = vmatprep.subr.mxu1 %v2529_v56 }
  0x45   :  { %686 = vmatpush1.msra.mxu1 %v2535_v57 }
  0x46   :  { %851 = vmatprep.subr.mxu1 %v2357_v29 }
  0xca   :  { %v167_v1 = vpop.f32.mrf.mxu0  ;;  %v203_v2 = vpop.f32.mrf.mxu1 }
  0xcb   :  { %v2583_v4 = vadd.f32 %v203_v2, %v59_v63 }
  0xcc   :  { %v169_v5 = vpop.f32.mrf.mxu0  ;;  %v205_v6 = vpop.f32.mrf.mxu1 }
  0xcd   :  { %3052 = vst [vmem:[#allocation5_spill] sm:$0xff] %v2583_v4  ;;  %v2585_v7 = vadd.f32 %v205_v6, %v63_v0 }
  0xcf   :  { %3053 = vst [vmem:[#allocation6_spill] sm:$0xff] %v2585_v7  ;;  %v173_v8 = vpop.f32.mrf.mxu0  ;;  %v168_v7 = vadd.f32 %v167_v1, %v59_v63 }
  0xd0   :  { %v2587_v9 = vadd.f32 %v173_v8, %v59_v63  ;;  %v209_v10 = vpop.f32.mrf.mxu1 }
  0xd1   :  { %v2589_v11 = vadd.f32 %v209_v10, %v59_v63  ;;  %v175_v13 = vpop.f32.mrf.mxu0 }
  0xd2   :  { %v2591_v15 = vadd.f32 %v175_v13, %v63_v0  ;;  %v211_v16 = vpop.f32.mrf.mxu1 }
  0xd3   :  { %3054 = vst [vmem:[#allocation7_spill] sm:$0xff] %v2589_v11  ;;  %v2593_v18 = vadd.f32 %v211_v16, %v63_v0 }
  0xd5   :  { %3055 = vst [vmem:[#allocation8_spill] sm:$0xff] %v2593_v18  ;;  %v179_v20 = vpop.f32.mrf.mxu0  ;;  %v280_v22 = vpop.f32.mrf.mxu1 }
  0xd6   :  { %v2595_v23 = vadd.f32 %v179_v20, %v59_v63 }
  0xd7   :  { %v181_v27 = vpop.f32.mrf.mxu0  ;;  %v282_v32 = vpop.f32.mrf.mxu1 }
  0xd8   :  { %v2597_v44 = vadd.f32 %v181_v27, %v63_v0 }
  0xd9   :  { %v185_v49 = vpop.f32.mrf.mxu0  ;;  %v286_v58 = vpop.f32.mrf.mxu1 }
  0xda   :  { %v2599_v61 = vadd.f32 %v185_v49, %v59_v63  ;;  %v2601_v2 = vadd.f32 %v286_v58, %v67_v38 }
  0xdb   :  { %v187_v6 = vpop.f32.mrf.mxu0  ;;  %v288_v8 = vpop.f32.mrf.mxu1 }
  0xdc   :  { %3056 = vst [vmem:[#allocation9_spill] sm:$0xff] %v2599_v61  ;;  %v2603_v10 = vadd.f32 %v187_v6, %v63_v0  ;;  %v2605_v13 = vadd.f32 %v288_v8, %v71_v60 }
  0xdd   :  { %v191_v16 = vpop.f32.mrf.mxu0 }
  0xde   :  { %3057 = vst [vmem:[#allocation10_spill] sm:$0xff] %v2603_v10  ;;  %v2607_v59 = vadd.f32 %v191_v16, %v59_v63  ;;  %v292_v20 = vpop.f32.mrf.mxu1 }
  0xdf   :  { %v2609_v19 = vadd.f32 %v292_v20, %v67_v38  ;;  %v193_v27 = vpop.f32.mrf.mxu0 }
  0xe0   :  { %3058 = vst [vmem:[#allocation11_spill] sm:$0xff] %v2607_v59  ;;  %v2611_v3 = vadd.f32 %v193_v27, %v63_v0  ;;  %v294_v62 = vpop.f32.mrf.mxu1  ;;  %v170_v27 = vadd.f32 %v169_v5, %v63_v0 }
  0xe1   :  { %3059 = vst [vmem:[#allocation12_spill] sm:$0xff] %v2609_v19  ;;  %v2613_v25 = vadd.f32 %v294_v62, %v71_v60 }
  0xe2   :  { %3060 = vst [vmem:[#allocation13_spill] sm:$0xff] %v2611_v3  ;;  %v197_v49 = vpop.f32.mrf.mxu0  ;;  %v298_v58 = vpop.f32.mrf.mxu1 }
  0xe3   :  { %v2615_v18 = vadd.f32 %v197_v49, %v59_v63  ;;  %v2617_v6 = vadd.f32 %v298_v58, %v67_v38 }
  0xe4   :  { %v199_v8 = vpop.f32.mrf.mxu0  ;;  %v300_v11 = vpop.f32.mrf.mxu1 }
  0xe5   :  { %3061 = vst [vmem:[#allocation14_spill] sm:$0xff] %v2615_v18  ;;  %3062 = vst [vmem:[#allocation15_spill] sm:$0xff] %v2617_v6  ;;  %v2619_v16 = vadd.f32 %v199_v8, %v63_v0  ;;  %v2621_v4 = vadd.f32 %v300_v11, %v71_v60 }
  0xe6   :  { %v304_v20 = vpop.f32.mrf.mxu1  ;;  %v470_v59 = vpop.f32.mrf.mxu0 }
  0xe7   :  { %v2623_v3 = vadd.f32 %v304_v20, %v67_v38  ;;  %v546_v62 = vadd.f32 %v470_v59, %v168_v7 }
  0xe8   :  { %v306_v10 = vpop.f32.mrf.mxu1  ;;  %v472_v61 = vpop.f32.mrf.mxu0 }
  0xe9   :  { %v1957_v19 = vmul.f32 -1.442695, %v546_v62  ;;  %v2625_v49 = vadd.f32 %v306_v10, %v71_v60  ;;  %v547_v58 = vadd.f32 %v472_v61, %v170_v27 }
  0xea   :  { %v310_v18 = vpop.f32.mrf.mxu1 }
  0xeb   :  { %2035 = vpow2.f32 %v1957_v19  ;;  %v1958_v6 = vmul.f32 -1.442695, %v547_v58  ;;  %v2627_v63 = vadd.f32 %v310_v18, %v67_v38  ;;  %v281_v19 = vadd.f32 %v280_v22, %v67_v38 }
  0xec   :  { %v312_v1 = vpop.f32.mrf.mxu1  ;;  %v283_v18 = vadd.f32 %v282_v32, %v71_v60 }
  0xed   :  { %3063 = vst [vmem:[#allocation16_spill] sm:$0xff] %v2627_v63  ;;  %2037 = vpow2.f32 %v1958_v6  ;;  %v2629_v11 = vadd.f32 %v312_v1, %v71_v60 }
  0xee   :  { %v316_v8 = vpop.f32.mrf.mxu1 }
  0xef   :  { %3064 = vst [vmem:[#allocation17_spill] sm:$0xff] %v2629_v11  ;;  %v2631_v0 = vadd.f32 %v316_v8, %v67_v38 }
  0xf0   :  { %v318_v5 = vpop.f32.mrf.mxu1 }
  0xf1   :  { %3065 = vst [vmem:[#allocation18_spill] sm:$0xff] %v2631_v0  ;;  %v2633_v7 = vadd.f32 %v318_v5, %v71_v60 }
  0xf2   :  { %v322_v59 = vpop.f32.mrf.mxu1 }
  0xf3   :  { %v2635_v20 = vadd.f32 %v322_v59, %v67_v38  ;;  %v360_v59 = vld [vmem:[#allocation3] sm:$0xff] }
  0xf4   :  { %v324_v10 = vpop.f32.mrf.mxu1 }
  0xf5   :  { %3066 = vst [vmem:[#allocation19_spill] sm:$0xff] %v2635_v20  ;;  %v2637_v61 = vadd.f32 %v324_v10, %v71_v60 }
  0xf6   :  { %v541_v27 = vpop.f32.mrf.mxu1 }
  0xf7   :  { %3067 = vst [vmem:[#allocation20_spill] sm:$0xff] %v2637_v61  ;;  %v548_v58 = vadd.f32 %v541_v27, %v281_v19 }
  0xf8   :  { %v2036_v62 = vpop.eup %2035  ;;  %v543_v6 = vpop.f32.mrf.mxu1 }
  0xf9   :  { %v553_v1 = vadd.f32 1.0, %v2036_v62  ;;  %v549_v63 = vadd.f32 %v543_v6, %v283_v18 }
  0xfa   :  { %v2038_v11 = vpop.eup %2037 }
  0xfb   :  { %2039 = vrcp.f32 %v553_v1  ;;  %v559_v8 = vadd.f32 1.0, %v2038_v11  ;;  %v1959_v0 = vmul.f32 -1.442695, %v549_v63  ;;  %v3068_v63 = vmov 0.0  }
  0xfc   :  { %2041 = vtanh.f32 %v548_v58 }
  0xfd   :  { %2043 = vrcp.f32 %v559_v8 }
  0xfe   :  { %2045 = vpow2.f32 %v1959_v0 }
 0x108   :  { %v2040_v5 = vpop.eup %2039 }
 0x109   :  { %v2042_v20 = vpop.eup %2041 }
 0x10a   :  { %v2044_v10 = vpop.eup %2043  ;;  %v570_v38 = vmul.f32 %v2042_v20, %v2040_v5 }
 0x10b   :  { %v2046_v61 = vpop.eup %2045  ;;  %v569_v22 = vmul.f32 %v2044_v10, %v360_v59 }
 0x10c   :  { %v566_v32 = vadd.f32 1.0, %v2046_v61 }
 0x10d   :  { %v2639_v60 = vadd.f32 %v570_v38, %v569_v22 }
 0x10e   :  { %2047 = vrcp.f32 %v566_v32 }
 0x10f   :  { %2049 = vtanh.f32 %v2639_v60 }
 0x11b   :  { %v2048_v19 = vpop.eup %2047 }
 0x11c   :  { %v2050_v27 = vpop.eup %2049 }
 0x11d   :  { %v573_v11 = vmul.f32 %v2050_v27, %v2048_v19 }
 0x11f   :  { %1960 = vmatmul.mubr.msk.f32.vlgmr.msra.gmra.mxu0 %vm27_vm0, %v573_v11  ;;  %1961 = vmatmul.mubr.msk.f32.vlgmr.msra.gmra.mxu1 %vm27_vm0, %v573_v11 }
 0x120   :  { %781 = vmatpush1.msra.mxu0 %v2284_v14  ;;  %852 = vmatpush1.msra.mxu1 %v2371_v31 }
 0x121   :  { %782 = vmatprep.subr.mxu0 %v2300_v17  ;;  %853 = vmatprep.subr.mxu1 %v2388_v34 }
 0x122   :  { %783 = vmatpush1.msra.mxu0 %v2318_v21  ;;  %854 = vmatpush1.msra.mxu1 %v2409_v37 }
 0x123   :  { %784 = vmatprep.subr.mxu0 %v2331_v24  ;;  %855 = vmatprep.subr.mxu1 %v2431_v41 }
 0x124   :  { %785 = vmatpush1.msra.mxu0 %v2342_v26  ;;  %856 = vmatpush1.msra.mxu1 %v2445_v43 }
 0x125   :  { %786 = vmatprep.subr.mxu0 %v2352_v28  ;;  %857 = vmatprep.subr.mxu1 %v2462_v46 }
 0x126   :  { %787 = vmatpush1.msra.mxu0 %v2364_v30  ;;  %858 = vmatpush1.msra.mxu1 %v2476_v48 }
 0x127   :  { %788 = vmatprep.subr.mxu0 %v2383_v33  ;;  %859 = vmatprep.subr.mxu1 %v2485_v50 }
 0x128   :  { %789 = vmatpush1.msra.mxu0 %v2395_v35  ;;  %860 = vmatpush1.msra.mxu1 %v2492_v51 }
 0x129   :  { %790 = vmatprep.subr.mxu0 %v2402_v36  ;;  %861 = vmatprep.subr.mxu1 %v2499_v52 }
 0x12a   :  { %791 = vmatpush1.msra.mxu0 %v2419_v39  ;;  %862 = vmatpush1.msra.mxu1 %v2507_v53 }
 0x12b   :  { %792 = vmatprep.subr.mxu0 %v2426_v40  ;;  %863 = vmatprep.subr.mxu1 %v2514_v54 }
 0x12c   :  { %793 = vmatpush1.msra.mxu0 %v2440_v42  ;;  %864 = vmatpush1.msra.mxu1 %v2521_v55 }
 0x12d   :  { %794 = vmatprep.subr.mxu0 %v2457_v45  ;;  %865 = vmatprep.subr.mxu1 %v2529_v56 }
 0x12e   :  { %795 = vmatpush1.msra.mxu0 %v2469_v47  ;;  %828 = vmatprep.mubr.f32.mxu0 %v3068_v63 }
 0x12f   :  { %866 = vmatpush1.msra.mxu1 %v2535_v57  ;;  %899 = vmatprep.mubr.f32.mxu1 %v3068_v63 }
 0x130   :  { %960 = vmatprep.subr.mxu0 %v2276_v12  ;;  %1031 = vmatprep.subr.mxu1 %v2357_v29 }
 0x1df   :  { %v650_v0 = vpop.f32.mrf.mxu0  ;;  %v721_v58 = vpop.f32.mrf.mxu1 }
 0x1e0   :  { %v726_v20 = vadd.f32 %v650_v0, %v2587_v9  ;;  %v728_v5 = vadd.f32 %v721_v58, %v2601_v2 }
 0x1e1   :  { %v652_v61 = vpop.f32.mrf.mxu0  ;;  %v723_v1 = vpop.f32.mrf.mxu1 }
 0x1e2   :  { %v1962_v18 = vmul.f32 -1.442695, %v726_v20  ;;  %v727_v62 = vadd.f32 %v652_v61, %v2591_v15  ;;  %v729_v8 = vadd.f32 %v723_v1, %v2605_v13 }
 0x1e4   :  { %2051 = vpow2.f32 %v1962_v18  ;;  %v1963_v6 = vmul.f32 -1.442695, %v727_v62  ;;  %v1964_v59 = vmul.f32 -1.442695, %v729_v8 }
 0x1e6   :  { %2053 = vpow2.f32 %v1963_v6 }
 0x1e7   :  { %2055 = vtanh.f32 %v728_v5 }
 0x1e8   :  { %2057 = vpow2.f32 %v1964_v59 }
 0x1f1   :  { %v2052_v10 = vpop.eup %2051 }
 0x1f2   :  { %v733_v22 = vadd.f32 1.0, %v2052_v10 }
 0x1f3   :  { %v2054_v38 = vpop.eup %2053 }
 0x1f4   :  { %2059 = vrcp.f32 %v733_v22  ;;  %v739_v9 = vadd.f32 1.0, %v2054_v38  ;;  %v2056_v32 = vpop.eup %2055  ;;  %v3069_v22 = vld [vmem:[#allocation12_spill] sm:$0xff] }
 0x1f5   :  { %v2058_v15 = vpop.eup %2057 }
 0x1f6   :  { %2061 = vrcp.f32 %v739_v9  ;;  %v746_v0 = vadd.f32 1.0, %v2058_v15 }
 0x1f8   :  { %2063 = vrcp.f32 %v746_v0 }
 0x201   :  { %v2060_v19 = vpop.eup %2059 }
 0x202   :  { %v750_v27 = vmul.f32 %v2060_v19, %v2056_v32 }
 0x203   :  { %v2062_v11 = vpop.eup %2061 }
 0x204   :  { %v749_v20 = vmul.f32 %v2062_v11, %v2639_v60 }
 0x205   :  { %v2064_v2 = vpop.eup %2063 }
 0x206   :  { %v2683_v13 = vadd.f32 %v750_v27, %v749_v20 }
 0x208   :  { %2065 = vtanh.f32 %v2683_v13 }
 0x215   :  { %v2066_v61 = vpop.eup %2065 }
 0x216   :  { %v753_v18 = vmul.f32 %v2066_v61, %v2064_v2 }
 0x218   :  { %1965 = vmatmul.mubr.msk.f32.vlgmr.msra.gmra.mxu0 %vm27_vm0, %v753_v18  ;;  %1966 = vmatmul.mubr.msk.f32.vlgmr.msra.gmra.mxu1 %vm27_vm0, %v753_v18 }
 0x219   :  { %961 = vmatpush1.msra.mxu0 %v2284_v14  ;;  %1032 = vmatpush1.msra.mxu1 %v2371_v31 }
 0x21a   :  { %962 = vmatprep.subr.mxu0 %v2300_v17  ;;  %1033 = vmatprep.subr.mxu1 %v2388_v34 }
 0x21b   :  { %963 = vmatpush1.msra.mxu0 %v2318_v21  ;;  %1034 = vmatpush1.msra.mxu1 %v2409_v37 }
 0x21c   :  { %964 = vmatprep.subr.mxu0 %v2331_v24  ;;  %1035 = vmatprep.subr.mxu1 %v2431_v41 }
 0x21d   :  { %965 = vmatpush1.msra.mxu0 %v2342_v26  ;;  %1036 = vmatpush1.msra.mxu1 %v2445_v43 }
 0x21e   :  { %966 = vmatprep.subr.mxu0 %v2352_v28  ;;  %1037 = vmatprep.subr.mxu1 %v2462_v46 }
 0x21f   :  { %967 = vmatpush1.msra.mxu0 %v2364_v30  ;;  %1038 = vmatpush1.msra.mxu1 %v2476_v48 }
 0x220   :  { %968 = vmatprep.subr.mxu0 %v2383_v33  ;;  %1039 = vmatprep.subr.mxu1 %v2485_v50 }
 0x221   :  { %969 = vmatpush1.msra.mxu0 %v2395_v35  ;;  %1040 = vmatpush1.msra.mxu1 %v2492_v51 }
 0x222   :  { %970 = vmatprep.subr.mxu0 %v2402_v36  ;;  %1041 = vmatprep.subr.mxu1 %v2499_v52 }
 0x223   :  { %971 = vmatpush1.msra.mxu0 %v2419_v39  ;;  %1042 = vmatpush1.msra.mxu1 %v2507_v53 }
 0x224   :  { %972 = vmatprep.subr.mxu0 %v2426_v40  ;;  %1043 = vmatprep.subr.mxu1 %v2514_v54 }
 0x225   :  { %973 = vmatpush1.msra.mxu0 %v2440_v42  ;;  %1044 = vmatpush1.msra.mxu1 %v2521_v55 }
 0x226   :  { %974 = vmatprep.subr.mxu0 %v2457_v45  ;;  %1045 = vmatprep.subr.mxu1 %v2529_v56 }
 0x227   :  { %975 = vmatpush1.msra.mxu0 %v2469_v47  ;;  %1008 = vmatprep.mubr.f32.mxu0 %v3068_v63 }
 0x228   :  { %1046 = vmatpush1.msra.mxu1 %v2535_v57  ;;  %1079 = vmatprep.mubr.f32.mxu1 %v3068_v63 }
 0x229   :  { %1140 = vmatprep.subr.mxu0 %v2276_v12  ;;  %1211 = vmatprep.subr.mxu1 %v2357_v29 }
 0x2d8   :  { %v830_v60 = vpop.f32.mrf.mxu0  ;;  %v901_v8 = vpop.f32.mrf.mxu1 }
 0x2d9   :  { %v906_v62 = vadd.f32 %v830_v60, %v2595_v23  ;;  %v908_v38 = vadd.f32 %v901_v8, %v3069_v22 }
 0x2da   :  { %v832_v58 = vpop.f32.mrf.mxu0  ;;  %v903_v59 = vpop.f32.mrf.mxu1 }
 0x2db   :  { %v1967_v6 = vmul.f32 -1.442695, %v906_v62  ;;  %v907_v1 = vadd.f32 %v832_v58, %v2597_v44  ;;  %v909_v10 = vadd.f32 %v903_v59, %v2613_v25  ;;  %v3070_v58 = vld [vmem:[#allocation9_spill] sm:$0xff] }
 0x2dd   :  { %2067 = vpow2.f32 %v1967_v6  ;;  %v1968_v5 = vmul.f32 -1.442695, %v907_v1  ;;  %v1969_v9 = vmul.f32 -1.442695, %v909_v10 }
 0x2df   :  { %2069 = vpow2.f32 %v1968_v5  ;;  %v3071_v5 = vld [vmem:[#allocation10_spill] sm:$0xff] }
 0x2e0   :  { %2071 = vtanh.f32 %v908_v38 }
 0x2e1   :  { %2073 = vpow2.f32 %v1969_v9 }
 0x2ea   :  { %v2068_v32 = vpop.eup %2067 }
 0x2eb   :  { %v913_v15 = vadd.f32 1.0, %v2068_v32  ;;  %v3072_v32 = vld [vmem:[#allocation15_spill] sm:$0xff] }
 0x2ec   :  { %v2070_v19 = vpop.eup %2069 }
 0x2ed   :  { %2075 = vrcp.f32 %v913_v15  ;;  %v919_v23 = vadd.f32 1.0, %v2070_v19  ;;  %v2072_v27 = vpop.eup %2071 }
 0x2ee   :  { %v2074_v44 = vpop.eup %2073 }
 0x2ef   :  { %2077 = vrcp.f32 %v919_v23  ;;  %v926_v2 = vadd.f32 1.0, %v2074_v44 }
 0x2f1   :  { %2079 = vrcp.f32 %v926_v2 }
 0x2fa   :  { %v2076_v11 = vpop.eup %2075 }
 0x2fb   :  { %v930_v0 = vmul.f32 %v2076_v11, %v2072_v27 }
 0x2fc   :  { %v2078_v20 = vpop.eup %2077 }
 0x2fd   :  { %v929_v61 = vmul.f32 %v2078_v20, %v2683_v13 }
 0x2fe   :  { %v2080_v18 = vpop.eup %2079 }
 0x2ff   :  { %v2727_v25 = vadd.f32 %v930_v0, %v929_v61 }
 0x301   :  { %2081 = vtanh.f32 %v2727_v25 }
 0x30e   :  { %v2082_v60 = vpop.eup %2081 }
 0x30f   :  { %v933_v62 = vmul.f32 %v2082_v60, %v2080_v18 }
 0x311   :  { %1970 = vmatmul.mubr.msk.f32.vlgmr.msra.gmra.mxu0 %vm27_vm0, %v933_v62  ;;  %1971 = vmatmul.mubr.msk.f32.vlgmr.msra.gmra.mxu1 %vm27_vm0, %v933_v62 }
 0x312   :  { %1141 = vmatpush1.msra.mxu0 %v2284_v14  ;;  %1212 = vmatpush1.msra.mxu1 %v2371_v31 }
 0x313   :  { %1142 = vmatprep.subr.mxu0 %v2300_v17  ;;  %1213 = vmatprep.subr.mxu1 %v2388_v34 }
 0x314   :  { %1143 = vmatpush1.msra.mxu0 %v2318_v21  ;;  %1214 = vmatpush1.msra.mxu1 %v2409_v37 }
 0x315   :  { %1144 = vmatprep.subr.mxu0 %v2331_v24  ;;  %1215 = vmatprep.subr.mxu1 %v2431_v41 }
 0x316   :  { %1145 = vmatpush1.msra.mxu0 %v2342_v26  ;;  %1216 = vmatpush1.msra.mxu1 %v2445_v43 }
 0x317   :  { %1146 = vmatprep.subr.mxu0 %v2352_v28  ;;  %1217 = vmatprep.subr.mxu1 %v2462_v46 }
 0x318   :  { %1147 = vmatpush1.msra.mxu0 %v2364_v30  ;;  %1218 = vmatpush1.msra.mxu1 %v2476_v48 }
 0x319   :  { %1148 = vmatprep.subr.mxu0 %v2383_v33  ;;  %1219 = vmatprep.subr.mxu1 %v2485_v50 }
 0x31a   :  { %1149 = vmatpush1.msra.mxu0 %v2395_v35  ;;  %1220 = vmatpush1.msra.mxu1 %v2492_v51 }
 0x31b   :  { %1150 = vmatprep.subr.mxu0 %v2402_v36  ;;  %1221 = vmatprep.subr.mxu1 %v2499_v52 }
 0x31c   :  { %1151 = vmatpush1.msra.mxu0 %v2419_v39  ;;  %1222 = vmatpush1.msra.mxu1 %v2507_v53 }
 0x31d   :  { %1152 = vmatprep.subr.mxu0 %v2426_v40  ;;  %1223 = vmatprep.subr.mxu1 %v2514_v54 }
 0x31e   :  { %1153 = vmatpush1.msra.mxu0 %v2440_v42  ;;  %1224 = vmatpush1.msra.mxu1 %v2521_v55 }
 0x31f   :  { %1154 = vmatprep.subr.mxu0 %v2457_v45  ;;  %1225 = vmatprep.subr.mxu1 %v2529_v56 }
 0x320   :  { %1155 = vmatpush1.msra.mxu0 %v2469_v47  ;;  %1188 = vmatprep.mubr.f32.mxu0 %v3068_v63 }
 0x321   :  { %1226 = vmatpush1.msra.mxu1 %v2535_v57  ;;  %1259 = vmatprep.mubr.f32.mxu1 %v3068_v63 }
 0x322   :  { %1320 = vmatprep.subr.mxu0 %v2276_v12  ;;  %1391 = vmatprep.subr.mxu1 %v2357_v29 }
 0x3d1   :  { %v1010_v13 = vpop.f32.mrf.mxu0  ;;  %v1081_v10 = vpop.f32.mrf.mxu1 }
 0x3d2   :  { %v1086_v6 = vadd.f32 %v1010_v13, %v3070_v58  ;;  %v1088_v15 = vadd.f32 %v1081_v10, %v3072_v32 }
 0x3d3   :  { %v1012_v1 = vpop.f32.mrf.mxu0  ;;  %v1083_v38 = vpop.f32.mrf.mxu1 }
 0x3d4   :  { %v1972_v8 = vmul.f32 -1.442695, %v1086_v6  ;;  %v1087_v59 = vadd.f32 %v1012_v1, %v3071_v5  ;;  %v1089_v9 = vadd.f32 %v1083_v38, %v2621_v4 }
 0x3d6   :  { %2083 = vpow2.f32 %v1972_v8  ;;  %v1973_v22 = vmul.f32 -1.442695, %v1087_v59  ;;  %v1974_v19 = vmul.f32 -1.442695, %v1089_v9 }
 0x3d8   :  { %2085 = vpow2.f32 %v1973_v22 }
 0x3d9   :  { %2087 = vtanh.f32 %v1088_v15 }
 0x3da   :  { %2089 = vpow2.f32 %v1974_v19 }
 0x3e3   :  { %v2084_v12 = vpop.eup %2083 }
 0x3e4   :  { %v1093_v23 = vadd.f32 1.0, %v2084_v12 }
 0x3e5   :  { %v2086_v27 = vpop.eup %2085 }
 0x3e6   :  { %2091 = vrcp.f32 %v1093_v23  ;;  %v1099_v44 = vadd.f32 1.0, %v2086_v27  ;;  %v2088_v11 = vpop.eup %2087 }
 0x3e7   :  { %v2090_v0 = vpop.eup %2089 }
 0x3e8   :  { %2093 = vrcp.f32 %v1099_v44  ;;  %v1106_v18 = vadd.f32 1.0, %v2090_v0  ;;  %v2835_v0 = vld [vmem:[%s3045_s2 + $0xc8] sm:$0xff] }
 0x3ea   :  { %2095 = vrcp.f32 %v1106_v18 }
 0x3f3   :  { %v2092_v20 = vpop.eup %2091 }
 0x3f4   :  { %v1110_v2 = vmul.f32 %v2092_v20, %v2088_v11  ;;  %v2828_v11 = vld [vmem:[%s3045_s2 + $0xe0] sm:$0xff] }
 0x3f5   :  { %v2094_v61 = vpop.eup %2093  ;;  %v2842_v20 = vld [vmem:[%s3045_s2 + $0xc0] sm:$0xff] }
 0x3f6   :  { %v1109_v60 = vmul.f32 %v2094_v61, %v2727_v25 }
 0x3f7   :  { %v2096_v62 = vpop.eup %2095 }
 0x3f8   :  { %v2771_v4 = vadd.f32 %v1110_v2, %v1109_v60 }
 0x3fa   :  { %2097 = vtanh.f32 %v2771_v4 }
 0x407   :  { %v2098_v13 = vpop.eup %2097 }
 0x408   :  { %v1113_v58 = vmul.f32 %v2098_v13, %v2096_v62 }
 0x40a   :  { %1975 = vmatmul.mubr.msk.f32.vlgmr.msra.gmra.mxu0 %vm27_vm0, %v1113_v58  ;;  %1976 = vmatmul.mubr.msk.f32.vlgmr.msra.gmra.mxu1 %vm27_vm0, %v1113_v58 }
 0x40b   :  { %1321 = vmatpush1.msra.mxu0 %v2284_v14  ;;  %1392 = vmatpush1.msra.mxu1 %v2371_v31  ;;  %v2811_v14 = vld [vmem:[%s3045_s2 + $0xe8] sm:$0xff] }
 0x40c   :  { %1322 = vmatprep.subr.mxu0 %v2300_v17  ;;  %1393 = vmatprep.subr.mxu1 %v2388_v34 }
 0x40d   :  { %1323 = vmatpush1.msra.mxu0 %v2318_v21  ;;  %1394 = vmatpush1.msra.mxu1 %v2409_v37  ;;  %v3073_v21 = vld [vmem:[#allocation11_spill] sm:$0xff] }
 0x40e   :  { %1324 = vmatprep.subr.mxu0 %v2331_v24  ;;  %1395 = vmatprep.subr.mxu1 %v2431_v41 }
 0x40f   :  { %1325 = vmatpush1.msra.mxu0 %v2342_v26  ;;  %1396 = vmatpush1.msra.mxu1 %v2445_v43 }
 0x410   :  { %1326 = vmatprep.subr.mxu0 %v2352_v28  ;;  %1397 = vmatprep.subr.mxu1 %v2462_v46 }
 0x411   :  { %1327 = vmatpush1.msra.mxu0 %v2364_v30  ;;  %1398 = vmatpush1.msra.mxu1 %v2476_v48  ;;  %v3074_v30 = vld [vmem:[#allocation13_spill] sm:$0xff] }
 0x412   :  { %1328 = vmatprep.subr.mxu0 %v2383_v33  ;;  %1399 = vmatprep.subr.mxu1 %v2485_v50 }
 0x413   :  { %1329 = vmatpush1.msra.mxu0 %v2395_v35  ;;  %1400 = vmatpush1.msra.mxu1 %v2492_v51 }
 0x414   :  { %1330 = vmatprep.subr.mxu0 %v2402_v36  ;;  %1401 = vmatprep.subr.mxu1 %v2499_v52 }
 0x415   :  { %1331 = vmatpush1.msra.mxu0 %v2419_v39  ;;  %1402 = vmatpush1.msra.mxu1 %v2507_v53 }
 0x416   :  { %1332 = vmatprep.subr.mxu0 %v2426_v40  ;;  %1403 = vmatprep.subr.mxu1 %v2514_v54 }
 0x417   :  { %1333 = vmatpush1.msra.mxu0 %v2440_v42  ;;  %1404 = vmatpush1.msra.mxu1 %v2521_v55 }
 0x418   :  { %1334 = vmatprep.subr.mxu0 %v2457_v45  ;;  %1405 = vmatprep.subr.mxu1 %v2529_v56 }
 0x419   :  { %1335 = vmatpush1.msra.mxu0 %v2469_v47  ;;  %1368 = vmatprep.mubr.f32.mxu0 %v3068_v63 }
 0x41a   :  { %1406 = vmatpush1.msra.mxu1 %v2535_v57  ;;  %1439 = vmatprep.mubr.f32.mxu1 %v3068_v63 }
 0x41b   :  { %1500 = vmatprep.subr.mxu0 %v2811_v14  ;;  %1571 = vmatprep.subr.mxu1 %v2357_v29 }
 0x4ca   :  { %v1190_v17 = vpop.f32.mrf.mxu0  ;;  %v1261_v35 = vpop.f32.mrf.mxu1 }
 0x4cb   :  { %v1266_v24 = vadd.f32 %v1190_v17, %v3073_v21  ;;  %v1268_v8 = vadd.f32 %v1261_v35, %v2623_v3  ;;  %v2176_v35 = vld [vmem:[%s3045_s2 + $0xd0] sm:$0xff] }
 0x4cc   :  { %v1192_v26 = vpop.f32.mrf.mxu0  ;;  %v1263_v6 = vpop.f32.mrf.mxu1 }
 0x4cd   :  { %v1977_v28 = vmul.f32 -1.442695, %v1266_v24  ;;  %v1267_v33 = vadd.f32 %v1192_v26, %v3074_v30  ;;  %v1269_v1 = vadd.f32 %v1263_v6, %v2625_v49  ;;  %v2174_v30 = vld [vmem:[%s3045_s2 + $0xf0] sm:$0xff] }
 0x4ce   :  { %v2178_v6 = vld [vmem:[%s3045_s2 + $0xb0] sm:$0xff] }
 0x4cf   :  { %2099 = vpow2.f32 %v1977_v28  ;;  %v1978_v25 = vmul.f32 -1.442695, %v1267_v33  ;;  %v1979_v5 = vmul.f32 -1.442695, %v1269_v1  ;;  %v2175_v33 = vld [vmem:[%s3045_s2 + $0xd8] sm:$0xff] }
 0x4d0   :  { %v2179_v1 = vld [vmem:[%s3045_s2 + $0x98] sm:$0xff] }
 0x4d1   :  { %2101 = vpow2.f32 %v1978_v25  ;;  %v2177_v25 = vld [vmem:[%s3045_s2 + $0xb8] sm:$0xff] }
 0x4d2   :  { %2103 = vtanh.f32 %v1268_v8  ;;  %v2180_v8 = vld [vmem:[%s3045_s2 + $0x90] sm:$0xff] }
 0x4d3   :  { %2105 = vpow2.f32 %v1979_v5  ;;  %v2181_v5 = vld [vmem:[%s3045_s2 + $0x78] sm:$0xff] }
 0x4dc   :  { %v2100_v59 = vpop.eup %2099 }
 0x4dd   :  { %v1273_v10 = vadd.f32 1.0, %v2100_v59  ;;  %v2182_v59 = vld [vmem:[%s3045_s2 + $0x70] sm:$0xff] }
 0x4de   :  { %v2102_v29 = vpop.eup %2101 }
 0x4df   :  { %2107 = vrcp.f32 %v1273_v10  ;;  %v1279_v22 = vadd.f32 1.0, %v2102_v29  ;;  %v2104_v38 = vpop.eup %2103  ;;  %v2183_v10 = vld [vmem:[%s3045_s2 + $0x48] sm:$0xff]  ;;  %v2184_v29 = vld [vmem:[%s3045_s2 + $0x58] sm:$0xff] }
 0x4e0   :  { %v2106_v9 = vpop.eup %2105 }
 0x4e1   :  { %2109 = vrcp.f32 %v1279_v22  ;;  %v1286_v12 = vadd.f32 1.0, %v2106_v9  ;;  %v2185_v22 = vld [vmem:[%s3045_s2 + $0x40] sm:$0xff]  ;;  %v2187_v9 = vld [vmem:[%s3045_s2 + $0x28] sm:$0xff] }
 0x4e3   :  { %2111 = vrcp.f32 %v1286_v12  ;;  %v2191_v12 = vld [vmem:[%s3045_s2 + $0x8] sm:$0xff] }
 0x4ec   :  { %v2108_v32 = vpop.eup %2107 }
 0x4ed   :  { %v1290_v15 = vmul.f32 %v2108_v32, %v2104_v38  ;;  %v2186_v38 = vld [vmem:[%s3045_s2 + $0x50] sm:$0xff]  ;;  %v2188_v32 = vld [vmem:[%s3045_s2 + $0x38] sm:$0xff] }
 0x4ee   :  { %v2110_v19 = vpop.eup %2109 }
 0x4ef   :  { %v1289_v23 = vmul.f32 %v2110_v19, %v2771_v4  ;;  %v2190_v19 = vld [vmem:[%s3045_s2 + $0x30] sm:$0xff] }
 0x4f0   :  { %v2112_v3 = vpop.eup %2111 }
 0x4f1   :  { %v2820_v49 = vadd.f32 %v1290_v15, %v1289_v23  ;;  %v2189_v15 = vld [vmem:[%s3045_s2 + $0x20] sm:$0xff]  ;;  %v2192_v23 = vld [vmem:[%s3045_s2 + $0x18] sm:$0xff] }
 0x4f3   :  { %2113 = vtanh.f32 %v2820_v49 }
 0x500   :  { %v2114_v27 = vpop.eup %2113 }
 0x501   :  { %v1293_v44 = vmul.f32 %v2114_v27, %v2112_v3  ;;  %v2194_v3 = vld [vmem:[%s3045_s2 + $0x10] sm:$0xff] }
 0x503   :  { %1980 = vmatmul.mubr.msk.f32.vlgmr.msra.gmra.mxu0 %vm27_vm0, %v1293_v44  ;;  %1981 = vmatmul.mubr.msk.f32.vlgmr.msra.gmra.mxu1 %vm27_vm0, %v1293_v44  ;;  %v3078_v44 = vld [vmem:[#allocation5_spill] sm:$0xff] }
 0x504   :  { %1501 = vmatpush1.msra.mxu0 %v2828_v11  ;;  %1572 = vmatpush1.msra.mxu1 %v2371_v31  ;;  %v2849_v31 = vld [vmem:[%s3045_s2 + $0xa8] sm:$0xff] }
 0x505   :  { %1502 = vmatprep.subr.mxu0 %v2835_v0  ;;  %1573 = vmatprep.subr.mxu1 %v2388_v34  ;;  %v2856_v34 = vld [vmem:[%s3045_s2 + $0xa0] sm:$0xff] }
 0x506   :  { %1503 = vmatpush1.msra.mxu0 %v2842_v20  ;;  %1574 = vmatpush1.msra.mxu1 %v2409_v37  ;;  %v2863_v37 = vld [vmem:[%s3045_s2 + $0x88] sm:$0xff] }
 0x507   :  { %1504 = vmatprep.subr.mxu0 %v2849_v31  ;;  %1575 = vmatprep.subr.mxu1 %v2431_v41  ;;  %v2870_v41 = vld [vmem:[%s3045_s2 + $0x80] sm:$0xff] }
 0x508   :  { %1505 = vmatpush1.msra.mxu0 %v2856_v34  ;;  %1576 = vmatpush1.msra.mxu1 %v2445_v43  ;;  %v2877_v43 = vld [vmem:[%s3045_s2 + $0x68] sm:$0xff] }
 0x509   :  { %1506 = vmatprep.subr.mxu0 %v2863_v37  ;;  %1577 = vmatprep.subr.mxu1 %v2462_v46  ;;  %v2884_v46 = vld [vmem:[%s3045_s2 + $0x60] sm:$0xff] }
 0x50a   :  { %1507 = vmatpush1.msra.mxu0 %v2870_v41  ;;  %1578 = vmatpush1.msra.mxu1 %v2476_v48 }
 0x50b   :  { %1508 = vmatprep.subr.mxu0 %v2877_v43  ;;  %1579 = vmatprep.subr.mxu1 %v2485_v50 }
 0x50c   :  { %1509 = vmatpush1.msra.mxu0 %v2884_v46  ;;  %1580 = vmatpush1.msra.mxu1 %v2492_v51 }
 0x50d   :  { %1510 = vmatprep.subr.mxu0 %v2402_v36  ;;  %1581 = vmatprep.subr.mxu1 %v2499_v52  ;;  %v2173_v36 = vld [vmem:[%s3045_s2 + $0xf8] sm:$0xff] }
 0x50e   :  { %1511 = vmatpush1.msra.mxu0 %v2419_v39  ;;  %1582 = vmatpush1.msra.mxu1 %v2507_v53  ;;  %v3076_v53 = vld [vmem:[#allocation17_spill] sm:$0xff] }
 0x50f   :  { %1512 = vmatprep.subr.mxu0 %v2426_v40  ;;  %1583 = vmatprep.subr.mxu1 %v2514_v54  ;;  %v3075_v40 = vld [vmem:[#allocation14_spill] sm:$0xff] }
 0x510   :  { %1513 = vmatpush1.msra.mxu0 %v2440_v42  ;;  %1584 = vmatpush1.msra.mxu1 %v2521_v55  ;;  %v3077_v55 = vld [vmem:[#allocation16_spill] sm:$0xff] }
 0x511   :  { %1514 = vmatprep.subr.mxu0 %v2457_v45  ;;  %1585 = vmatprep.subr.mxu1 %v2529_v56 }
 0x512   :  { %1515 = vmatpush1.msra.mxu0 %v2469_v47  ;;  %1548 = vmatprep.mubr.f32.mxu0 %v3068_v63 }
 0x513   :  { %1586 = vmatpush1.msra.mxu1 %v2535_v57  ;;  %1619 = vmatprep.mubr.f32.mxu1 %v3068_v63 }
 0x514   :  { %1680 = vmatprep.subr.mxu0 %v2811_v14  ;;  %1751 = vmatprep.subr.mxu1 %v2173_v36  ;;  %v3080_v36 = vld [vmem:[#allocation18_spill] sm:$0xff] }
 0x5c3   :  { %v1370_v39 = vpop.f32.mrf.mxu0  ;;  %v1441_v50 = vpop.f32.mrf.mxu1 }
 0x5c4   :  { %v1446_v42 = vadd.f32 %v1370_v39, %v3075_v40  ;;  %v1448_v56 = vadd.f32 %v1441_v50, %v3077_v55 }
 0x5c5   :  { %v1372_v45 = vpop.f32.mrf.mxu0  ;;  %v1443_v52 = vpop.f32.mrf.mxu1 }
 0x5c6   :  { %v1982_v48 = vmul.f32 -1.442695, %v1446_v42  ;;  %v1447_v47 = vadd.f32 %v1372_v45, %v2619_v16  ;;  %v1449_v54 = vadd.f32 %v1443_v52, %v3076_v53 }
 0x5c8   :  { %2115 = vpow2.f32 %v1982_v48  ;;  %v1983_v51 = vmul.f32 -1.442695, %v1447_v47  ;;  %v1984_v57 = vmul.f32 -1.442695, %v1449_v54 }
 0x5ca   :  { %2117 = vpow2.f32 %v1983_v51 }
 0x5cb   :  { %2119 = vtanh.f32 %v1448_v56 }
 0x5cc   :  { %2121 = vpow2.f32 %v1984_v57 }
 0x5d5   :  { %v2116_v2 = vpop.eup %2115 }
 0x5d6   :  { %v1453_v61 = vadd.f32 1.0, %v2116_v2 }
 0x5d7   :  { %v2118_v18 = vpop.eup %2117 }
 0x5d8   :  { %2123 = vrcp.f32 %v1453_v61  ;;  %v1459_v60 = vadd.f32 1.0, %v2118_v18  ;;  %v2120_v4 = vpop.eup %2119  ;;  %v1846_v18 = vld [vmem:[%s3047_s4 + $0x38] sm:$0xff] }
 0x5d9   :  { %v2122_v16 = vpop.eup %2121 }
 0x5da   :  { %2125 = vrcp.f32 %v1459_v60  ;;  %v1466_v14 = vadd.f32 1.0, %v2122_v16  ;;  %v1845_v60 = vld [vmem:[%s3047_s4 + $0x30] sm:$0xff]  ;;  %v1843_v16 = vld [vmem:[%s3047_s4 + $0x20] sm:$0xff] }
 0x5dc   :  { %2127 = vrcp.f32 %v1466_v14  ;;  %v1839_v14 = vld [vmem:[%s3047_s4] sm:$0xff] }
 0x5e5   :  { %v2124_v62 = vpop.eup %2123 }
 0x5e6   :  { %v1470_v13 = vmul.f32 %v2124_v62, %v2120_v4  ;;  %v1844_v4 = vld [vmem:[%s3047_s4 + $0x28] sm:$0xff]  ;;  %v1842_v62 = vld [vmem:[%s3047_s4 + $0x18] sm:$0xff] }
 0x5e7   :  { %v2126_v58 = vpop.eup %2125 }
 0x5e8   :  { %v1469_v17 = vmul.f32 %v2126_v58, %v2820_v49  ;;  %v2193_v49 = vld [vmem:[%s3045_s2] sm:$0xff]  ;;  %v1840_v58 = vld [vmem:[%s3047_s4 + $0x8] sm:$0xff] }
 0x5e9   :  { %v2128_v24 = vpop.eup %2127 }
 0x5ea   :  { %v2911_v21 = vadd.f32 %v1470_v13, %v1469_v17  ;;  %v1841_v13 = vld [vmem:[%s3047_s4 + $0x10] sm:$0xff] }
 0x5ec   :  { %2129 = vtanh.f32 %v2911_v21 }
 0x5f9   :  { %v2130_v26 = vpop.eup %2129 }
 0x5fa   :  { %v1473_v28 = vmul.f32 %v2130_v26, %v2128_v24 }
 0x5fc   :  { %1985 = vmatmul.mubr.msk.f32.vlgmr.msra.gmra.mxu0 %vm27_vm0, %v1473_v28  ;;  %1986 = vmatmul.mubr.msk.f32.vlgmr.msra.gmra.mxu1 %vm27_vm0, %v1473_v28 }
 0x5fd   :  { %1681 = vmatpush1.msra.mxu0 %v2828_v11  ;;  %1752 = vmatpush1.msra.mxu1 %v2174_v30  ;;  %v3082_v30 = vld [vmem:[#allocation8_spill] sm:$0xff] }
 0x5fe   :  { %1682 = vmatprep.subr.mxu0 %v2835_v0  ;;  %1753 = vmatprep.subr.mxu1 %v2175_v33 }
 0x5ff   :  { %1683 = vmatpush1.msra.mxu0 %v2842_v20  ;;  %1754 = vmatpush1.msra.mxu1 %v2176_v35 }
 0x600   :  { %1684 = vmatprep.subr.mxu0 %v2849_v31  ;;  %1755 = vmatprep.subr.mxu1 %v2177_v25  ;;  %v3079_v31 = vld [vmem:[#allocation6_spill] sm:$0xff] }
 0x601   :  { %1685 = vmatpush1.msra.mxu0 %v2856_v34  ;;  %1756 = vmatpush1.msra.mxu1 %v2178_v6 }
 0x602   :  { %1686 = vmatprep.subr.mxu0 %v2863_v37  ;;  %1757 = vmatprep.subr.mxu1 %v2179_v1  ;;  %v3083_v1 = vld [vmem:[#allocation20_spill] sm:$0xff] }
 0x603   :  { %1687 = vmatpush1.msra.mxu0 %v2870_v41  ;;  %1758 = vmatpush1.msra.mxu1 %v2180_v8 }
 0x604   :  { %1688 = vmatprep.subr.mxu0 %v2877_v43  ;;  %1759 = vmatprep.subr.mxu1 %v2181_v5  ;;  %v3084_v5 = vld [vmem:[#allocation19_spill] sm:$0xff] }
 0x605   :  { %1689 = vmatpush1.msra.mxu0 %v2884_v46  ;;  %1760 = vmatpush1.msra.mxu1 %v2182_v59 }
 0x606   :  { %1690 = vmatprep.subr.mxu0 %v2183_v10  ;;  %1761 = vmatprep.subr.mxu1 %v2184_v29 }
 0x607   :  { %1691 = vmatpush1.msra.mxu0 %v2185_v22  ;;  %1762 = vmatpush1.msra.mxu1 %v2186_v38 }
 0x608   :  { %1692 = vmatprep.subr.mxu0 %v2187_v9  ;;  %1763 = vmatprep.subr.mxu1 %v2188_v32 }
 0x609   :  { %1693 = vmatpush1.msra.mxu0 %v2189_v15  ;;  %1764 = vmatpush1.msra.mxu1 %v2190_v19 }
 0x60a   :  { %1694 = vmatprep.subr.mxu0 %v2191_v12  ;;  %1765 = vmatprep.subr.mxu1 %v2192_v23 }
 0x60b   :  { %1695 = vmatpush1.msra.mxu0 %v2193_v49  ;;  %1728 = vmatprep.mubr.f32.mxu0 %v3068_v63 }
 0x60c   :  { %1766 = vmatpush1.msra.mxu1 %v2194_v3  ;;  %1799 = vmatprep.mubr.f32.mxu1 %v3068_v63 }
 0x60d   :  { %2006 = vmatprep.subr.mxu0 %v3068_v63 }
 0x6bc   :  { %v1550_v27 = vpop.f32.mrf.mxu0  ;;  %v1621_v37 = vpop.f32.mrf.mxu1 }
 0x6bd   :  { %v1626_v11 = vadd.f32 %v1550_v27, %v3078_v44  ;;  %v1628_v39 = vadd.f32 %v1621_v37, %v3080_v36 }
 0x6be   :  { %v1552_v0 = vpop.f32.mrf.mxu0  ;;  %v1623_v43 = vpop.f32.mrf.mxu1 }
 0x6bf   :  { %v1987_v20 = vmul.f32 -1.442695, %v1626_v11  ;;  %v1627_v34 = vadd.f32 %v1552_v0, %v3079_v31  ;;  %v1629_v46 = vadd.f32 %v1623_v43, %v2633_v7  ;;  %v1995_v0 = vld [vmem:[%s3048_s5] ss:$0 sm:$0xff] }
 0x6c1   :  { %2131 = vpow2.f32 %v1987_v20  ;;  %v1988_v41 = vmul.f32 -1.442695, %v1627_v34  ;;  %v1989_v40 = vmul.f32 -1.442695, %v1629_v46 }
 0x6c3   :  { %2133 = vpow2.f32 %v1988_v41 }
 0x6c4   :  { %2135 = vtanh.f32 %v1628_v39 }
 0x6c5   :  { %2137 = vpow2.f32 %v1989_v40 }
 0x6ce   :  { %v2132_v42 = vpop.eup %2131 }
 0x6cf   :  { %v1633_v45 = vadd.f32 1.0, %v2132_v42 }
 0x6d0   :  { %v2134_v48 = vpop.eup %2133 }
 0x6d1   :  { %2139 = vrcp.f32 %v1633_v45  ;;  %v1639_v47 = vadd.f32 1.0, %v2134_v48  ;;  %v2136_v50 = vpop.eup %2135 }
 0x6d2   :  { %v2138_v51 = vpop.eup %2137 }
 0x6d3   :  { %2141 = vrcp.f32 %v1639_v47  ;;  %v1646_v55 = vadd.f32 1.0, %v2138_v51 }
 0x6d5   :  { %2143 = vrcp.f32 %v1646_v55 }
 0x6de   :  { %v2140_v52 = vpop.eup %2139 }
 0x6df   :  { %v1650_v53 = vmul.f32 %v2140_v52, %v2136_v50 }
 0x6e0   :  { %v2142_v54 = vpop.eup %2141 }
 0x6e1   :  { %v1649_v56 = vmul.f32 %v2142_v54, %v2911_v21  ;;  %v3081_v21 = vld [vmem:[#allocation7_spill] sm:$0xff] }
 0x6e2   :  { %v2144_v57 = vpop.eup %2143 }
 0x6e3   :  { %v1651_v7 = vadd.f32 %v1650_v53, %v1649_v56 }
 0x6e5   :  { %2145 = vtanh.f32 %v1651_v7 }
 0x6f2   :  { %v2146_v2 = vpop.eup %2145 }
 0x6f3   :  { %v1653_v61 = vmul.f32 %v2146_v2, %v2144_v57 }
 0x6f5   :  { %1990 = vmatmul.mubr.msk.f32.vlgmr.msra.gmra.mxu0 %vm27_vm0, %v1653_v61  ;;  %1991 = vmatmul.mubr.msk.f32.vlgmr.msra.gmra.mxu1 %vm27_vm0, %v1653_v61 }
 0x6f6   :  { %2022 = vmatprep.mubr.msk.f32.mxu0 %vm2196_vm2, %v3068_v63  ;;  %2007 = vmatpush3.msra.mxu0 %v1846_v18 }
 0x6f7   :  { %2008 = vmatprep.subr.mxu0 %v3068_v63 }
 0x6f8   :  { %2009 = vmatpush3.msra.mxu0 %v1845_v60 }
 0x6f9   :  { %2010 = vmatprep.subr.mxu0 %v3068_v63 }
 0x6fa   :  { %2011 = vmatpush3.msra.mxu0 %v1844_v4 }
 0x6fb   :  { %2012 = vmatprep.subr.mxu0 %v3068_v63 }
 0x6fc   :  { %2013 = vmatpush3.msra.mxu0 %v1843_v16 }
 0x6fd   :  { %2014 = vmatprep.subr.mxu0 %v3068_v63 }
 0x6fe   :  { %2015 = vmatpush3.msra.mxu0 %v1842_v62 }
 0x6ff   :  { %2016 = vmatprep.subr.mxu0 %v3068_v63 }
 0x700   :  { %2017 = vmatpush3.msra.mxu0 %v1841_v13 }
 0x701   :  { %2018 = vmatprep.subr.mxu0 %v3068_v63 }
 0x702   :  { %2019 = vmatpush3.msra.mxu0 %v1840_v58 }
 0x703   :  { %2020 = vmatprep.subr.mxu0 %v3068_v63 }
 0x704   :  { %2021 = vmatpush3.msra.mxu0 %v1839_v14 }
 0x7b5   :  { %v1730_v17 = vpop.f32.mrf.mxu0  ;;  %v1801_v35 = vpop.f32.mrf.mxu1 }
 0x7b6   :  { %v1806_v24 = vadd.f32 %v1730_v17, %v3081_v21  ;;  %v1808_v59 = vadd.f32 %v1801_v35, %v3084_v5 }
 0x7b7   :  { %v1732_v26 = vpop.f32.mrf.mxu0  ;;  %v1803_v6 = vpop.f32.mrf.mxu1 }
 0x7b8   :  { %v1992_v28 = vmul.f32 -1.442695, %v1806_v24  ;;  %v1807_v33 = vadd.f32 %v1732_v26, %v3082_v30  ;;  %v1809_v8 = vadd.f32 %v1803_v6, %v3083_v1 }
 0x7ba   :  { %2147 = vpow2.f32 %v1992_v28  ;;  %v1993_v25 = vmul.f32 -1.442695, %v1807_v33  ;;  %v1994_v10 = vmul.f32 -1.442695, %v1809_v8 }
 0x7bc   :  { %2149 = vpow2.f32 %v1993_v25 }
 0x7bd   :  { %2151 = vtanh.f32 %v1808_v59 }
 0x7be   :  { %2153 = vpow2.f32 %v1994_v10 }
 0x7c7   :  { %v2148_v29 = vpop.eup %2147 }
 0x7c8   :  { %v1813_v63 = vadd.f32 1.0, %v2148_v29 }
 0x7c9   :  { %v2150_v22 = vpop.eup %2149 }
 0x7ca   :  { %2155 = vrcp.f32 %v1813_v63  ;;  %v1819_v38 = vadd.f32 1.0, %v2150_v22  ;;  %v2152_v9 = vpop.eup %2151 }
 0x7cb   :  { %v2154_v32 = vpop.eup %2153 }
 0x7cc   :  { %2157 = vrcp.f32 %v1819_v38  ;;  %v1826_v23 = vadd.f32 1.0, %v2154_v32 }
 0x7ce   :  { %2159 = vrcp.f32 %v1826_v23 }
 0x7d7   :  { %v2156_v15 = vpop.eup %2155 }
 0x7d8   :  { %v1830_v19 = vmul.f32 %v2156_v15, %v2152_v9 }
 0x7d9   :  { %v2158_v12 = vpop.eup %2157 }
 0x7da   :  { %v1829_v49 = vmul.f32 %v2158_v12, %v1651_v7 }
 0x7db   :  { %v2160_v27 = vpop.eup %2159 }
 0x7dc   :  { %v1831_v3 = vadd.f32 %v1830_v19, %v1829_v49 }
 0x7de   :  { %2161 = vtanh.f32 %v1831_v3  ;;  %1835 = vst.msk [vmem:[#allocation3] sm:$0xff] %vm27_vm0, %v1831_v3 }
 0x7eb   :  { %v2162_v44 = vpop.eup %2161 }
 0x7ec   :  { %v1833_v11 = vmul.f32 %v2162_v44, %v2160_v27 }
 0x7ee   :  { %1834 = vst.msk [vmem:[#allocation2] sm:$0xff] %vm27_vm0, %v1833_v11  ;;  %2023 = vmatmul.mubr.msk.f32.vlgmr.msra.gmra.mxu0 %vm27_vm0, %v1833_v11 }
 0x8ae   :  { %v1923_v20 = vpop.f32.mrf.mxu0 }
 0x8af   :  { %v1924_v31 = vadd.f32 %v1995_v0, %v1923_v20 }
 0x8b0   :  { %v2024_v34 = vpop.f32.mrf.mxu0 }
 0x8b1   :  { %1927 = vst [vmem:[%s3049_s6] sm:$0xff] %v1924_v31 }

</bundles_post_ra>
